<compile_context>
chip_gen: v7x
topology: tpu7x:2x2x1
jax: 0.10.0
libtpu: 0.0.40
codegen_flags: <defaults>
</compile_context>

<pallas_src>
import functools

import jax
import jax.numpy as jnp
from jax.experimental import pallas as pl
from jax.experimental.pallas import tpu as pltpu


def _round_up(n: int, m: int) -> int:
    return ((n + m - 1) // m) * m


def classifier_kernel(xf_ref, wbig_ref, b1_ref, w2_ref, b2_ref, o_ref):
    # xf:   (tile_r, 640)   lane-dense view: lane j of row r holds
    #                       x[r*128 + j//5, j%5]
    # wbig: (640, 1280)     fused de-interleave + first-layer weights:
    #                       wbig[5l+k, 128n+l] = w1[k, n]
    # b1:   (1, 1280)       b1 repeated per 128-lane group (VMEM resident)
    # w2:   (1, 10)  SMEM   final-layer weight row
    # b2:   (1, 1)   SMEM   final-layer bias scalar
    # o:    (tile_r, 128)   lane l of row r = output for batch row r*128 + l
    x = xf_ref[...].astype(jnp.float32)

    # first_layer (+ de-interleave) on the MXU, bias + ReLU on the VPU.
    h = jnp.dot(x, wbig_ref[...], preferred_element_type=jnp.float32) + b1_ref[...]
    h = jnp.maximum(h, 0.0)                       # (tile_r, 1280)

    # final_layer: weighted sum of the 10 hidden lane-groups (pure VPU,
    # static 128-aligned lane slices, scalar broadcasts from SMEM).
    logits = h[:, 0:128] * w2_ref[0, 0]
    for n in range(1, 10):
        logits = logits + h[:, n * 128:(n + 1) * 128] * w2_ref[0, n]
    logits = logits + b2_ref[0, 0]                # (tile_r, 128)

    # Softmax over dim=1 (size-1 axis) == 1.0 for finite logits, NaN otherwise.
    # `logits - logits + 1.0` matches that bit-for-bit without exp/max/sum/div.
    o_ref[...] = logits - logits + jnp.float32(1.0)


@functools.partial(jax.jit, static_argnames=("tile_b",))
def classifier_forward(x, w1, b1, w2, b2, *, tile_b=16384):
    """Forward pass of Classifier.  x: (B, 5) -> probabilities: (B, 1) f32."""
    B, f_in = x.shape
    assert f_in == 5, x.shape

    # --- lane-dense view of x: (B128//128, 640), free metadata reshape ------
    B128 = _round_up(B, 128)
    if B128 != B:
        # Only for batches that are not 128-aligned (pads <=127 rows, but does
        # copy x once).  128-aligned batches take the zero-copy path.
        x = jnp.pad(x, ((0, B128 - B), (0, 0)))
    n_groups = B128 // 128                      # 128-row batch groups
    xf = x.reshape(n_groups, 640)

    # --- fused de-interleave + first-layer weight matrix ---------------------
    # wbig[l*5 + k, n*128 + l2] = w1[k, n] * (l == l2)
    lane_eye = jnp.eye(128, dtype=jnp.float32)
    wbig = (lane_eye[:, None, None, :] * w1[None, :, :, None].astype(jnp.float32))
    wbig = wbig.reshape(640, 1280)
    b1rep = jnp.repeat(b1.reshape(1, 10).astype(jnp.float32), 128, axis=1)  # (1, 1280)
    w2s = w2.reshape(1, 10).astype(jnp.float32)       # SMEM scalars
    b2s = b2.reshape(1, 1).astype(jnp.float32)        # SMEM scalar

    # --- tiling: 128-row groups per grid step --------------------------------
    tile_r_req = max(1, tile_b // 128)
    if n_groups <= 8:
        tile_r = n_groups                        # single full-extent block
    else:
        want = max(8, _round_up(min(tile_r_req, n_groups), 8))
        # keep >= 2 grid steps so v7x can use both TensorCores and the
        # input/output DMA pipeline has something to overlap with.
        cap_two_steps = _round_up(pl.cdiv(n_groups, 2), 8)
        tile_r = min(want, cap_two_steps)
    num_tiles = pl.cdiv(n_groups, tile_r)

    cost = pl.CostEstimate(
        flops=130 * B128,                          # useful flops of the forward
        transcendentals=0,
        bytes_accessed=24 * B128 + wbig.size * 4,  # x read + out write + weights
    )

    out2d = pl.pallas_call(
        classifier_kernel,
        out_shape=jax.ShapeDtypeStruct((n_groups, 128), jnp.float32),
        grid=(num_tiles,),
        in_specs=[
            pl.BlockSpec((tile_r, 640), lambda i: (i, 0)),    # xf: streamed, contiguous DMA
            pl.BlockSpec((640, 1280), lambda i: (0, 0)),      # wbig: VMEM resident
            pl.BlockSpec((1, 1280), lambda i: (0, 0)),        # b1rep: VMEM resident
            pl.BlockSpec((1, 10), lambda i: (0, 0),
                         memory_space=pltpu.MemorySpace.SMEM),  # w2 scalars
            pl.BlockSpec((1, 1), lambda i: (0, 0),
                         memory_space=pltpu.MemorySpace.SMEM),  # b2 scalar
        ],
        out_specs=pl.BlockSpec((tile_r, 128), lambda i: (i, 0)),  # lane-dense output
        compiler_params=pltpu.CompilerParams(
            dimension_semantics=("parallel",),
            vmem_limit_bytes=32 * 1024 * 1024,
        ),
        cost_estimate=cost,
    )(xf, wbig, b1rep, w2s, b2s)

    # (n_groups, 128) -> (B128, 1) is a free, order-preserving metadata reshape.
    return out2d.reshape(B128, 1)[:B]


def init_params(key):
    """Deterministic PyTorch-style uniform(-1/sqrt(fan_in), 1/sqrt(fan_in)) init."""
    k1, k2, k3, k4 = jax.random.split(key, 4)
    bound1 = 1.0 / jnp.sqrt(5.0)
    bound2 = 1.0 / jnp.sqrt(10.0)
    # w1 stored as [in, out] (transposed vs torch); w2 kept in torch [out, in]
    # layout (1, 10); b2 as (1, 1).
    w1 = jax.random.uniform(k1, (5, 10), jnp.float32, -bound1, bound1)
    b1 = jax.random.uniform(k2, (1, 10), jnp.float32, -bound1, bound1)
    w2 = jax.random.uniform(k3, (1, 10), jnp.float32, -bound2, bound2)
    b2 = jax.random.uniform(k4, (1, 1), jnp.float32, -bound2, bound2)
    return w1, b1, w2, b2


if __name__ == "__main__":
    key = jax.random.PRNGKey(0)
    k_x, k_p = jax.random.split(key)

    # B deliberately not a multiple of 128 so the 128-alignment pad, the
    # multi-step grid and a partial (clamped) last block are all exercised.
    B = 2500
    x = jax.random.normal(k_x, (B, 5), jnp.float32)
    w1, b1, w2, b2 = init_params(k_p)

    out = classifier_forward(x, w1, b1, w2, b2, tile_b=1024)
    out = jax.block_until_ready(out)

    # Plain-JAX reference of the PyTorch forward pass.
    h_ref = jnp.maximum(x @ w1 + b1, 0.0)
    logits_ref = h_ref @ w2.T + b2
    ref = jax.nn.softmax(logits_ref, axis=1)

    assert out.shape == (B, 1), out.shape
    assert jnp.allclose(out, ref, atol=1e-6), (out, ref)

    # NaN propagation / batch-index mapping check: a NaN in row 1234 must show
    # up in output row 1234, and rows in other 128-row groups must stay 1.0.
    x_bad = x.at[1234, 2].set(jnp.nan)
    out_bad = jax.block_until_ready(
        classifier_forward(x_bad, w1, b1, w2, b2, tile_b=1024))
    assert jnp.isnan(out_bad[1234, 0])
    assert not jnp.isnan(out_bad[200, 0])     # different group, different tile
    assert not jnp.isnan(out_bad[1100, 0])    # different group, same tile

    print("KERNEL_OK")
</pallas_src>

<mosaic_0001>
module attributes {stable_mosaic.version = 11 : i64} {
  func.func @classifier_kernel(%arg0: i32, %arg1: memref<8x640xf32, #tpu.memory_space<vmem>>, %arg2: memref<640x1280xf32, #tpu.memory_space<vmem>>, %arg3: memref<1x1280xf32, #tpu.memory_space<vmem>>, %arg4: memref<1x10xf32, #tpu.memory_space<smem>>, %arg5: memref<1x1xf32, #tpu.memory_space<smem>>, %arg6: memref<8x128xf32, #tpu.memory_space<vmem>>) attributes {dimension_semantics = [#tpu.dimension_semantics<parallel>], iteration_bounds = array<i64: 3>, scalar_prefetch = 0 : i64, scratch_operands = 0 : i64, tpu.core_type = #tpu.core_type<tc>, window_params = [{transform_indices = @transform_0, window_bounds = array<i64: 8, 640>}, {pipeline_mode = #tpu.pipeline_mode<synchronous>, transform_indices = @transform_1, window_bounds = array<i64: 640, 1280>}, {pipeline_mode = #tpu.pipeline_mode<synchronous>, transform_indices = @transform_2, window_bounds = array<i64: 1, 1280>}, {transform_indices = @transform_3, window_bounds = array<i64: 1, 10>}, {transform_indices = @transform_4, window_bounds = array<i64: 1, 1>}, {transform_indices = @transform_5, window_bounds = array<i64: 8, 128>}]} {
    %c0 = arith.constant 0 : index
    %c0_0 = arith.constant 0 : index
    %0 = vector.load %arg1[%c0, %c0_0] : memref<8x640xf32, #tpu.memory_space<vmem>>, vector<8x640xf32>
    %c0_1 = arith.constant 0 : index
    %c0_2 = arith.constant 0 : index
    %1 = vector.load %arg2[%c0_1, %c0_2] : memref<640x1280xf32, #tpu.memory_space<vmem>>, vector<640x1280xf32>
    %cst = arith.constant dense<0.000000e+00> : vector<8x1280xf32>
    %2 = tpu.matmul %0, %1, %cst {dimension_numbers = #tpu.dot_dimension_numbers<[1], [0], [0], [1], [0, 0, 1, 1], [], []>} : vector<8x640xf32>, vector<640x1280xf32>, vector<8x1280xf32> -> vector<8x1280xf32>
    %c0_3 = arith.constant 0 : index
    %c0_4 = arith.constant 0 : index
    %3 = vector.load %arg3[%c0_3, %c0_4] : memref<1x1280xf32, #tpu.memory_space<vmem>>, vector<1x1280xf32>
    %4 = vector.broadcast %3 : vector<1x1280xf32> to vector<8x1280xf32>
    %5 = arith.addf %2, %4 : vector<8x1280xf32>
    %cst_5 = arith.constant 0.000000e+00 : f32
    %6 = vector.broadcast %cst_5 : f32 to vector<8x1280xf32>
    %7 = arith.maximumf %5, %6 : vector<8x1280xf32>
    %8 = vector.extract_strided_slice %7 {offsets = [0, 0], sizes = [8, 128], strides = [1, 1]} : vector<8x1280xf32> to vector<8x128xf32>
    %c0_6 = arith.constant 0 : index
    %c0_7 = arith.constant 0 : index
    %9 = memref.load %arg4[%c0_6, %c0_7] : memref<1x10xf32, #tpu.memory_space<smem>>
    %10 = vector.broadcast %9 : f32 to vector<8x128xf32>
    %11 = arith.mulf %8, %10 : vector<8x128xf32>
    %12 = vector.extract_strided_slice %7 {offsets = [0, 128], sizes = [8, 128], strides = [1, 1]} : vector<8x1280xf32> to vector<8x128xf32>
    %c0_8 = arith.constant 0 : index
    %c1 = arith.constant 1 : index
    %13 = memref.load %arg4[%c0_8, %c1] : memref<1x10xf32, #tpu.memory_space<smem>>
    %14 = vector.broadcast %13 : f32 to vector<8x128xf32>
    %15 = arith.mulf %12, %14 : vector<8x128xf32>
    %16 = arith.addf %11, %15 : vector<8x128xf32>
    %17 = vector.extract_strided_slice %7 {offsets = [0, 256], sizes = [8, 128], strides = [1, 1]} : vector<8x1280xf32> to vector<8x128xf32>
    %c0_9 = arith.constant 0 : index
    %c2 = arith.constant 2 : index
    %18 = memref.load %arg4[%c0_9, %c2] : memref<1x10xf32, #tpu.memory_space<smem>>
    %19 = vector.broadcast %18 : f32 to vector<8x128xf32>
    %20 = arith.mulf %17, %19 : vector<8x128xf32>
    %21 = arith.addf %16, %20 : vector<8x128xf32>
    %22 = vector.extract_strided_slice %7 {offsets = [0, 384], sizes = [8, 128], strides = [1, 1]} : vector<8x1280xf32> to vector<8x128xf32>
    %c0_10 = arith.constant 0 : index
    %c3 = arith.constant 3 : index
    %23 = memref.load %arg4[%c0_10, %c3] : memref<1x10xf32, #tpu.memory_space<smem>>
    %24 = vector.broadcast %23 : f32 to vector<8x128xf32>
    %25 = arith.mulf %22, %24 : vector<8x128xf32>
    %26 = arith.addf %21, %25 : vector<8x128xf32>
    %27 = vector.extract_strided_slice %7 {offsets = [0, 512], sizes = [8, 128], strides = [1, 1]} : vector<8x1280xf32> to vector<8x128xf32>
    %c0_11 = arith.constant 0 : index
    %c4 = arith.constant 4 : index
    %28 = memref.load %arg4[%c0_11, %c4] : memref<1x10xf32, #tpu.memory_space<smem>>
    %29 = vector.broadcast %28 : f32 to vector<8x128xf32>
    %30 = arith.mulf %27, %29 : vector<8x128xf32>
    %31 = arith.addf %26, %30 : vector<8x128xf32>
    %32 = vector.extract_strided_slice %7 {offsets = [0, 640], sizes = [8, 128], strides = [1, 1]} : vector<8x1280xf32> to vector<8x128xf32>
    %c0_12 = arith.constant 0 : index
    %c5 = arith.constant 5 : index
    %33 = memref.load %arg4[%c0_12, %c5] : memref<1x10xf32, #tpu.memory_space<smem>>
    %34 = vector.broadcast %33 : f32 to vector<8x128xf32>
    %35 = arith.mulf %32, %34 : vector<8x128xf32>
    %36 = arith.addf %31, %35 : vector<8x128xf32>
    %37 = vector.extract_strided_slice %7 {offsets = [0, 768], sizes = [8, 128], strides = [1, 1]} : vector<8x1280xf32> to vector<8x128xf32>
    %c0_13 = arith.constant 0 : index
    %c6 = arith.constant 6 : index
    %38 = memref.load %arg4[%c0_13, %c6] : memref<1x10xf32, #tpu.memory_space<smem>>
    %39 = vector.broadcast %38 : f32 to vector<8x128xf32>
    %40 = arith.mulf %37, %39 : vector<8x128xf32>
    %41 = arith.addf %36, %40 : vector<8x128xf32>
    %42 = vector.extract_strided_slice %7 {offsets = [0, 896], sizes = [8, 128], strides = [1, 1]} : vector<8x1280xf32> to vector<8x128xf32>
    %c0_14 = arith.constant 0 : index
    %c7 = arith.constant 7 : index
    %43 = memref.load %arg4[%c0_14, %c7] : memref<1x10xf32, #tpu.memory_space<smem>>
    %44 = vector.broadcast %43 : f32 to vector<8x128xf32>
    %45 = arith.mulf %42, %44 : vector<8x128xf32>
    %46 = arith.addf %41, %45 : vector<8x128xf32>
    %47 = vector.extract_strided_slice %7 {offsets = [0, 1024], sizes = [8, 128], strides = [1, 1]} : vector<8x1280xf32> to vector<8x128xf32>
    %c0_15 = arith.constant 0 : index
    %c8 = arith.constant 8 : index
    %48 = memref.load %arg4[%c0_15, %c8] : memref<1x10xf32, #tpu.memory_space<smem>>
    %49 = vector.broadcast %48 : f32 to vector<8x128xf32>
    %50 = arith.mulf %47, %49 : vector<8x128xf32>
    %51 = arith.addf %46, %50 : vector<8x128xf32>
    %52 = vector.extract_strided_slice %7 {offsets = [0, 1152], sizes = [8, 128], strides = [1, 1]} : vector<8x1280xf32> to vector<8x128xf32>
    %c0_16 = arith.constant 0 : index
    %c9 = arith.constant 9 : index
    %53 = memref.load %arg4[%c0_16, %c9] : memref<1x10xf32, #tpu.memory_space<smem>>
    %54 = vector.broadcast %53 : f32 to vector<8x128xf32>
    %55 = arith.mulf %52, %54 : vector<8x128xf32>
    %56 = arith.addf %51, %55 : vector<8x128xf32>
    %c0_17 = arith.constant 0 : index
    %c0_18 = arith.constant 0 : index
    %57 = memref.load %arg5[%c0_17, %c0_18] : memref<1x1xf32, #tpu.memory_space<smem>>
    %58 = vector.broadcast %57 : f32 to vector<8x128xf32>
    %59 = arith.addf %56, %58 : vector<8x128xf32>
    %60 = arith.subf %59, %59 : vector<8x128xf32>
    %cst_19 = arith.constant 1.000000e+00 : f32
    %61 = vector.broadcast %cst_19 : f32 to vector<8x128xf32>
    %62 = arith.addf %60, %61 : vector<8x128xf32>
    %c0_20 = arith.constant 0 : index
    %c0_21 = arith.constant 0 : index
    %63 = vector.load %arg6[%c0_20, %c0_21] : memref<8x128xf32, #tpu.memory_space<vmem>>, vector<8x128xf32>
    tpu.vector_store %arg6[%c0_20, %c0_21], %62 {strides = array<i32>} : memref<8x128xf32, #tpu.memory_space<vmem>>, vector<8x128xf32>,
    return
  }
  func.func @transform_0(%arg0: i32) -> (i32, i32) {
    %c0_i32 = arith.constant 0 : i32
    %c0_i32_0 = arith.constant 0 : i32
    return %arg0, %c0_i32 : i32, i32
  }
  func.func @transform_1(%arg0: i32) -> (i32, i32) {
    %c0_i32 = arith.constant 0 : i32
    %c0_i32_0 = arith.constant 0 : i32
    %c0_i32_1 = arith.constant 0 : i32
    return %c0_i32, %c0_i32_0 : i32, i32
  }
  func.func @transform_2(%arg0: i32) -> (i32, i32) {
    %c0_i32 = arith.constant 0 : i32
    %c0_i32_0 = arith.constant 0 : i32
    %c0_i32_1 = arith.constant 0 : i32
    return %c0_i32, %c0_i32_0 : i32, i32
  }
  func.func @transform_3(%arg0: i32) -> (i32, i32) {
    %c0_i32 = arith.constant 0 : i32
    %c0_i32_0 = arith.constant 0 : i32
    %c0_i32_1 = arith.constant 0 : i32
    return %c0_i32, %c0_i32_0 : i32, i32
  }
  func.func @transform_4(%arg0: i32) -> (i32, i32) {
    %c0_i32 = arith.constant 0 : i32
    %c0_i32_0 = arith.constant 0 : i32
    %c0_i32_1 = arith.constant 0 : i32
    return %c0_i32, %c0_i32_0 : i32, i32
  }
  func.func @transform_5(%arg0: i32) -> (i32, i32) {
    %c0_i32 = arith.constant 0 : i32
    %c0_i32_0 = arith.constant 0 : i32
    return %arg0, %c0_i32 : i32, i32
  }
}

</mosaic_0001>

<bundles_post_ra>
// kernel: classifier_forward.1
= control target key start
LH: loop header
LB: loop body
LE: loop exit
PB: predicated region body
PF: predicated region fallthrough
CT: control target
= control target key end

     0   :  { %s5774_s0 = inlined_call_operand.vmem [shape: f32[20,640], index: 0, kind: input, shape index: {}]   ;;  %s5775_s1 = inlined_call_operand.vmem [shape: f32[640,1280], index: 1, kind: input, shape index: {}]   ;;  %s5776_s2 = inlined_call_operand.vmem [shape: f32[1,1280], index: 2, kind: input, shape index: {}]   ;;  %s5777_s3 = inlined_call_operand.vmem [shape: f32[1,10], index: 3, kind: input, shape index: {}]   ;;  %s5778_s4 = inlined_call_operand.<no memory space> [shape: f32[1,1], index: 4, kind: input, shape index: {}]   ;;  %s5779_s5 = inlined_call_operand.vmem [shape: f32[20,128], index: 5, kind: output, shape index: {}]  }
   0x1   :  { %10 = sst [smem:[#allocation2]] %s5778_s4 }
   0x2   :  { %11 = vsyncpa [#allocation4], 0  ;;  %s3222_s20 = smov 0  }
   0x3 LB: > { %s3228_s21 = sadd.s32 4294967295, %s3185_s20   ;;  %p2284_p0 = scmp.ge.s32.totalorder %s3185_s20, 1  ;;  %s3185_s20 = sphi %s3222_s20, %s17_s20  }
   0x4   : > { %p158_p1 = scmp.lt.s32.totalorder %s3185_s20, 4  ;;  %s177_s4 = sshll.u32 %s5777_s3, 4  ;;  %s178_s4 = int_to_ptr.vmem [resolvable:$true] %s177_s4 }
   0x5   : > { %p3141_p3 = scmp.eq.s32.totalorder %s3228_s21, 0  ;;  %s3160_s25 = scalar_lea.vmem %s178_s4, 16 }
   0x6   : > { %p3235_p2 = pnand %p2284_p0, %p158_p1  ;;  %p3161_p6 = scmp.ne.s32.totalorder %s178_s4, %s3160_s25 }
   0x7   : > { %p3168_p10 = scmp.lt.s32.totalorder %s178_s4, %s178_s4  ;;  %p3169_p11 = scmp.lt.s32.totalorder %s3160_s25, %s3160_s25 }
   0x8   : > { %p3137_p4 = pneg %p3235_p2 }
   0x9   : > { %p3170_p12 = por %p3169_p11, %p3168_p10 }
   0xa   : > { %p3138_p5 = pnand %p3141_p3, %p3137_p4 }
   0xc   : > { %p3162_p7 = pneg %p3138_p5 }
   0xe   : > { %p3163_p8 = pnand %p3162_p7, %p3161_p6 }
  0x10   : > { %p3164_p9 = pneg %p3163_p8 }
  0x12   : > { %p3171_p13 = pnand %p3170_p12, %p3164_p9 }
  0x14   : > { %3174 = shalt.err (!%p3171_p13)
}
  0x15   : > { %s3187_s26 = smov [#allocation3]   ;;  %201 = sbr.rel (%p3235_p2) target bundleno = 680 (0x2a8), region = 40 }
  0x16   : > { %3140 = dma.vmem_to_smem (!%p3138_p5), %s178_s4, 16, %s3187_s26, [#allocation4]  }
  0x1c   : > { %3180 = dma.done.wait (%p3141_p3), [#allocation4], 16  }
  0x1d   : > { %3182 = vsyncadd (%p3141_p3), [#allocation4], 4294967280 }
  0x1e   : > { %207 = sfence }
  0x1f   : > { %v244_v0 = vld [vmem:[%s5775_s1 + $0x8] sm:$0xff]  ;;  %v254_v1 = vld [vmem:[%s5775_s1 + $0x58] sm:$0xff]  ;;  %v243_v5 = vld [vmem:[%s5775_s1] sm:$0xff]  ;;  %p229_p0 = scmp.lt.s32.totalorder %s3228_s21, 2  ;;  %s5184_s4 = sld [smem:[#allocation3]] }
  0x20   : > { %v564_v2 = vld [vmem:[%s5775_s1 + $0xa08] sm:$0xff]  ;;  %v2302_v3 = vpack.c.bf16 %v254_v1, %v244_v0  ;;  %v574_v4 = vld [vmem:[%s5775_s1 + $0xa58] sm:$0xff]  ;;  %v253_v6 = vld [vmem:[%s5775_s1 + $0x50] sm:$0xff]  ;;  %s5195_s30 = sld [smem:[#allocation3 + $0x1]]  ;;  %s2292_s15 = sld [smem:[#allocation3 + $0x2]] }
  0x21   : > { %v2366_v7 = vpack.c.bf16 %v574_v4, %v564_v2  ;;  %v2304_v8 = vpack.c.bf16 %v253_v6, %v243_v5  ;;  %v563_v9 = vld [vmem:[%s5775_s1 + $0xa00] sm:$0xff]  ;;  %v573_v10 = vld [vmem:[%s5775_s1 + $0xa50] sm:$0xff]  ;;  %v264_v11 = vld [vmem:[%s5775_s1 + $0xa8] sm:$0xff]  ;;  %s5782_s21 = smov (!%p229_p0, %s3228_s21), 2  ;;  %s2293_s16 = sld [smem:[#allocation3 + $0x3]] }
  0x22   : > { %2303 = vmatprep.subr.bf16.mxu1 %v2302_v3  ;;  %v2368_v12 = vpack.c.bf16 %v573_v10, %v563_v9  ;;  %v274_v13 = vld [vmem:[%s5775_s1 + $0xf8] sm:$0xff]  ;;  %v584_v14 = vld [vmem:[%s5775_s1 + $0xaa8] sm:$0xff]  ;;  %v263_v18 = vld [vmem:[%s5775_s1 + $0xa0] sm:$0xff]  ;;  %s3132_s27 = smul.u32 40, %s5782_s21  ;;  %s2295_s17 = sld [smem:[#allocation3 + $0x5]] }
  0x23   : > { %v594_v15 = vld [vmem:[%s5775_s1 + $0xaf8] sm:$0xff]  ;;  %2367 = vmatprep.subr.bf16.mxu0 %v2366_v7  ;;  %2305 = vmatpush1.bf16.msra.mxu1 %v2304_v8  ;;  %v2306_v16 = vpack.c.bf16 %v274_v13, %v264_v11  ;;  %v273_v19 = vld [vmem:[%s5775_s1 + $0xf0] sm:$0xff]  ;;  %v583_v20 = vld [vmem:[%s5775_s1 + $0xaa0] sm:$0xff]  ;;  %s2296_s18 = sld [smem:[#allocation3 + $0x6]]  ;;  %s2297_s19 = sld [smem:[#allocation3 + $0x7]] }
  0x24   : > { %v2370_v17 = vpack.c.bf16 %v594_v15, %v584_v14  ;;  %2369 = vmatpush1.bf16.msra.mxu0 %v2368_v12  ;;  %v2308_v21 = vpack.c.bf16 %v273_v19, %v263_v18  ;;  %v593_v22 = vld [vmem:[%s5775_s1 + $0xaf0] sm:$0xff]  ;;  %v284_v23 = vld [vmem:[%s5775_s1 + $0x148] sm:$0xff]  ;;  %v294_v24 = vld [vmem:[%s5775_s1 + $0x198] sm:$0xff]  ;;  %s3536_s23 = scalar_lea.vmem %s5774_s0, %s3132_s27  ;;  %s2298_s24 = sld [smem:[#allocation3 + $0x8]] }
  0x25   : > { %2307 = vmatprep.subr.bf16.mxu1 %v2306_v16  ;;  %v2372_v25 = vpack.c.bf16 %v593_v22, %v583_v20  ;;  %v2310_v26 = vpack.c.bf16 %v294_v24, %v284_v23  ;;  %v604_v27 = vld [vmem:[%s5775_s1 + $0xb48] sm:$0xff]  ;;  %v614_v28 = vld [vmem:[%s5775_s1 + $0xb98] sm:$0xff]  ;;  %v283_v29 = vld [vmem:[%s5775_s1 + $0x140] sm:$0xff]  ;;  %s2299_s25 = sld [smem:[#allocation3 + $0x9]]  ;;  %s2211_s26 = sld [smem:[#allocation2]] }
  0x26   : > { %2371 = vmatprep.subr.bf16.mxu0 %v2370_v17  ;;  %v2374_v30 = vpack.c.bf16 %v614_v28, %v604_v27  ;;  %v293_v31 = vld [vmem:[%s5775_s1 + $0x190] sm:$0xff]  ;;  %v603_v32 = vld [vmem:[%s5775_s1 + $0xb40] sm:$0xff]  ;;  %v304_v35 = vld [vmem:[%s5775_s1 + $0x1e8] sm:$0xff] }
  0x27   : > { %v613_v33 = vld [vmem:[%s5775_s1 + $0xb90] sm:$0xff]  ;;  %2309 = vmatpush1.bf16.msra.mxu1 %v2308_v21  ;;  %v2312_v34 = vpack.c.bf16 %v293_v31, %v283_v29  ;;  %v314_v36 = vld [vmem:[%s5775_s1 + $0x238] sm:$0xff]  ;;  %v624_v37 = vld [vmem:[%s5775_s1 + $0xbe8] sm:$0xff] }
  0x28   : > { %2373 = vmatpush1.bf16.msra.mxu0 %v2372_v25  ;;  %2311 = vmatprep.subr.bf16.mxu1 %v2310_v26  ;;  %v2376_v38 = vpack.c.bf16 %v613_v33, %v603_v32  ;;  %v2314_v39 = vpack.c.bf16 %v314_v36, %v304_v35  ;;  %v634_v40 = vld [vmem:[%s5775_s1 + $0xc38] sm:$0xff]  ;;  %v303_v41 = vld [vmem:[%s5775_s1 + $0x1e0] sm:$0xff]  ;;  %v313_v42 = vld [vmem:[%s5775_s1 + $0x230] sm:$0xff] }
  0x29   : > { %2375 = vmatprep.subr.bf16.mxu0 %v2374_v30  ;;  %v2378_v43 = vpack.c.bf16 %v634_v40, %v624_v37  ;;  %v623_v44 = vld [vmem:[%s5775_s1 + $0xbe0] sm:$0xff]  ;;  %v633_v45 = vld [vmem:[%s5775_s1 + $0xc30] sm:$0xff]  ;;  %v324_v46 = vld [vmem:[%s5775_s1 + $0x288] sm:$0xff]  ;;  %v2316_v50 = vpack.c.bf16 %v313_v42, %v303_v41 }
  0x2a   : > { %v334_v47 = vld [vmem:[%s5775_s1 + $0x2d8] sm:$0xff]  ;;  %v644_v48 = vld [vmem:[%s5775_s1 + $0xc88] sm:$0xff]  ;;  %v2380_v51 = vpack.c.bf16 %v633_v45, %v623_v44  ;;  %v323_v53 = vld [vmem:[%s5775_s1 + $0x280] sm:$0xff] }
  0x2b   : > { %v654_v49 = vld [vmem:[%s5775_s1 + $0xcd8] sm:$0xff]  ;;  %2313 = vmatpush1.bf16.msra.mxu1 %v2312_v34  ;;  %v2318_v52 = vpack.c.bf16 %v334_v47, %v324_v46  ;;  %v333_v54 = vld [vmem:[%s5775_s1 + $0x2d0] sm:$0xff]  ;;  %v643_v55 = vld [vmem:[%s5775_s1 + $0xc80] sm:$0xff] }
  0x2c   : > { %2377 = vmatpush1.bf16.msra.mxu0 %v2376_v38  ;;  %2315 = vmatprep.subr.bf16.mxu1 %v2314_v39  ;;  %v2382_v56 = vpack.c.bf16 %v654_v49, %v644_v48  ;;  %v653_v57 = vld [vmem:[%s5775_s1 + $0xcd0] sm:$0xff]  ;;  %v344_v58 = vld [vmem:[%s5775_s1 + $0x328] sm:$0xff]  ;;  %v354_v59 = vld [vmem:[%s5775_s1 + $0x378] sm:$0xff]  ;;  %v2320_v62 = vpack.c.bf16 %v333_v54, %v323_v53 }
  0x2d   : > { %2379 = vmatprep.subr.bf16.mxu0 %v2378_v43  ;;  %v664_v60 = vld [vmem:[%s5775_s1 + $0xd28] sm:$0xff]  ;;  %v674_v61 = vld [vmem:[%s5775_s1 + $0xd78] sm:$0xff]  ;;  %v2384_v63 = vpack.c.bf16 %v653_v57, %v643_v55  ;;  %v2322_v0 = vpack.c.bf16 %v354_v59, %v344_v58  ;;  %v343_v1 = vld [vmem:[%s5775_s1 + $0x320] sm:$0xff] }
  0x2e   : > { %v353_v2 = vld [vmem:[%s5775_s1 + $0x370] sm:$0xff]  ;;  %v663_v3 = vld [vmem:[%s5775_s1 + $0xd20] sm:$0xff]  ;;  %v2386_v4 = vpack.c.bf16 %v674_v61, %v664_v60  ;;  %v364_v6 = vld [vmem:[%s5775_s1 + $0x3c8] sm:$0xff] }
  0x2f   : > { %2317 = vmatpush1.bf16.msra.mxu1 %v2316_v50  ;;  %v673_v5 = vld [vmem:[%s5775_s1 + $0xd70] sm:$0xff]  ;;  %v374_v7 = vld [vmem:[%s5775_s1 + $0x418] sm:$0xff]  ;;  %v684_v8 = vld [vmem:[%s5775_s1 + $0xdc8] sm:$0xff]  ;;  %v2324_v10 = vpack.c.bf16 %v353_v2, %v343_v1 }
  0x30   : > { %2381 = vmatpush1.bf16.msra.mxu0 %v2380_v51  ;;  %2319 = vmatprep.subr.bf16.mxu1 %v2318_v52  ;;  %v694_v9 = vld [vmem:[%s5775_s1 + $0xe18] sm:$0xff]  ;;  %v2388_v11 = vpack.c.bf16 %v673_v5, %v663_v3  ;;  %v2326_v12 = vpack.c.bf16 %v374_v7, %v364_v6  ;;  %v363_v13 = vld [vmem:[%s5775_s1 + $0x3c0] sm:$0xff]  ;;  %v373_v14 = vld [vmem:[%s5775_s1 + $0x410] sm:$0xff] }
  0x31   : > { %2383 = vmatprep.subr.bf16.mxu0 %v2382_v56  ;;  %v683_v15 = vld [vmem:[%s5775_s1 + $0xdc0] sm:$0xff]  ;;  %v2390_v16 = vpack.c.bf16 %v694_v9, %v684_v8  ;;  %v693_v17 = vld [vmem:[%s5775_s1 + $0xe10] sm:$0xff]  ;;  %v384_v18 = vld [vmem:[%s5775_s1 + $0x468] sm:$0xff]  ;;  %v2328_v22 = vpack.c.bf16 %v373_v14, %v363_v13 }
  0x32   : > { %v394_v19 = vld [vmem:[%s5775_s1 + $0x4b8] sm:$0xff]  ;;  %v704_v20 = vld [vmem:[%s5775_s1 + $0xe68] sm:$0xff]  ;;  %v2392_v23 = vpack.c.bf16 %v693_v17, %v683_v15  ;;  %v383_v25 = vld [vmem:[%s5775_s1 + $0x460] sm:$0xff] }
  0x33   : > { %2321 = vmatpush1.bf16.msra.mxu1 %v2320_v62  ;;  %v714_v21 = vld [vmem:[%s5775_s1 + $0xeb8] sm:$0xff]  ;;  %v2330_v24 = vpack.c.bf16 %v394_v19, %v384_v18  ;;  %v393_v26 = vld [vmem:[%s5775_s1 + $0x4b0] sm:$0xff]  ;;  %v703_v27 = vld [vmem:[%s5775_s1 + $0xe60] sm:$0xff] }
  0x34   : > { %2385 = vmatpush1.bf16.msra.mxu0 %v2384_v63  ;;  %2323 = vmatprep.subr.bf16.mxu1 %v2322_v0  ;;  %v2394_v28 = vpack.c.bf16 %v714_v21, %v704_v20  ;;  %v713_v29 = vld [vmem:[%s5775_s1 + $0xeb0] sm:$0xff]  ;;  %v404_v30 = vld [vmem:[%s5775_s1 + $0x508] sm:$0xff]  ;;  %v414_v31 = vld [vmem:[%s5775_s1 + $0x558] sm:$0xff]  ;;  %v2332_v34 = vpack.c.bf16 %v393_v26, %v383_v25 }
  0x35   : > { %2387 = vmatprep.subr.bf16.mxu0 %v2386_v4  ;;  %v724_v32 = vld [vmem:[%s5775_s1 + $0xf08] sm:$0xff]  ;;  %v734_v33 = vld [vmem:[%s5775_s1 + $0xf58] sm:$0xff]  ;;  %v2396_v35 = vpack.c.bf16 %v713_v29, %v703_v27  ;;  %v2334_v36 = vpack.c.bf16 %v414_v31, %v404_v30  ;;  %v403_v37 = vld [vmem:[%s5775_s1 + $0x500] sm:$0xff] }
  0x36   : > { %v413_v38 = vld [vmem:[%s5775_s1 + $0x550] sm:$0xff]  ;;  %v723_v39 = vld [vmem:[%s5775_s1 + $0xf00] sm:$0xff]  ;;  %v2398_v40 = vpack.c.bf16 %v734_v33, %v724_v32  ;;  %v424_v42 = vld [vmem:[%s5775_s1 + $0x5a8] sm:$0xff] }
  0x37   : > { %2325 = vmatpush1.bf16.msra.mxu1 %v2324_v10  ;;  %v733_v41 = vld [vmem:[%s5775_s1 + $0xf50] sm:$0xff]  ;;  %v434_v43 = vld [vmem:[%s5775_s1 + $0x5f8] sm:$0xff]  ;;  %v744_v44 = vld [vmem:[%s5775_s1 + $0xfa8] sm:$0xff]  ;;  %v2336_v46 = vpack.c.bf16 %v413_v38, %v403_v37 }
  0x38   : > { %2389 = vmatpush1.bf16.msra.mxu0 %v2388_v11  ;;  %2327 = vmatprep.subr.bf16.mxu1 %v2326_v12  ;;  %v754_v45 = vld [vmem:[%s5775_s1 + $0xff8] sm:$0xff]  ;;  %v2400_v47 = vpack.c.bf16 %v733_v41, %v723_v39  ;;  %v2338_v48 = vpack.c.bf16 %v434_v43, %v424_v42  ;;  %v423_v49 = vld [vmem:[%s5775_s1 + $0x5a0] sm:$0xff]  ;;  %v433_v50 = vld [vmem:[%s5775_s1 + $0x5f0] sm:$0xff] }
  0x39   : > { %2391 = vmatprep.subr.bf16.mxu0 %v2390_v16  ;;  %v743_v51 = vld [vmem:[%s5775_s1 + $0xfa0] sm:$0xff]  ;;  %v2402_v52 = vpack.c.bf16 %v754_v45, %v744_v44  ;;  %v753_v53 = vld [vmem:[%s5775_s1 + $0xff0] sm:$0xff]  ;;  %v444_v54 = vld [vmem:[%s5775_s1 + $0x648] sm:$0xff]  ;;  %v2340_v58 = vpack.c.bf16 %v433_v50, %v423_v49 }
  0x3a   : > { %v454_v55 = vld [vmem:[%s5775_s1 + $0x698] sm:$0xff]  ;;  %v764_v56 = vld [vmem:[%s5775_s1 + $0x1048] sm:$0xff]  ;;  %v2404_v59 = vpack.c.bf16 %v753_v53, %v743_v51  ;;  %v443_v61 = vld [vmem:[%s5775_s1 + $0x640] sm:$0xff] }
  0x3b   : > { %2329 = vmatpush1.bf16.msra.mxu1 %v2328_v22  ;;  %v774_v57 = vld [vmem:[%s5775_s1 + $0x1098] sm:$0xff]  ;;  %v2342_v60 = vpack.c.bf16 %v454_v55, %v444_v54  ;;  %v453_v62 = vld [vmem:[%s5775_s1 + $0x690] sm:$0xff]  ;;  %v763_v63 = vld [vmem:[%s5775_s1 + $0x1040] sm:$0xff] }
  0x3c   : > { %2393 = vmatpush1.bf16.msra.mxu0 %v2392_v23  ;;  %2331 = vmatprep.subr.bf16.mxu1 %v2330_v24  ;;  %v2406_v0 = vpack.c.bf16 %v774_v57, %v764_v56  ;;  %v773_v1 = vld [vmem:[%s5775_s1 + $0x1090] sm:$0xff]  ;;  %v464_v2 = vld [vmem:[%s5775_s1 + $0x6e8] sm:$0xff]  ;;  %v474_v3 = vld [vmem:[%s5775_s1 + $0x738] sm:$0xff]  ;;  %v2344_v6 = vpack.c.bf16 %v453_v62, %v443_v61 }
  0x3d   : > { %2395 = vmatprep.subr.bf16.mxu0 %v2394_v28  ;;  %v784_v4 = vld [vmem:[%s5775_s1 + $0x10e8] sm:$0xff]  ;;  %v794_v5 = vld [vmem:[%s5775_s1 + $0x1138] sm:$0xff]  ;;  %v463_v7 = vld [vmem:[%s5775_s1 + $0x6e0] sm:$0xff]  ;;  %v2408_v8 = vpack.c.bf16 %v773_v1, %v763_v63  ;;  %v2346_v9 = vpack.c.bf16 %v474_v3, %v464_v2 }
  0x3e   : > { %v473_v10 = vld [vmem:[%s5775_s1 + $0x730] sm:$0xff]  ;;  %v783_v11 = vld [vmem:[%s5775_s1 + $0x10e0] sm:$0xff]  ;;  %v2410_v13 = vpack.c.bf16 %v794_v5, %v784_v4  ;;  %v484_v14 = vld [vmem:[%s5775_s1 + $0x788] sm:$0xff] }
  0x3f   : > { %2333 = vmatpush1.bf16.msra.mxu1 %v2332_v34  ;;  %v793_v12 = vld [vmem:[%s5775_s1 + $0x1130] sm:$0xff]  ;;  %v494_v15 = vld [vmem:[%s5775_s1 + $0x7d8] sm:$0xff]  ;;  %v3557_v16 = vld [vmem:[%s3536_s23 + $0x8] sm:$0xff]  ;;  %v2348_v20 = vpack.c.bf16 %v473_v10, %v463_v7 }
  0x40   : > { %2397 = vmatpush1.bf16.msra.mxu0 %v2396_v35  ;;  %2335 = vmatprep.subr.bf16.mxu1 %v2334_v36  ;;  %v804_v17 = vld [vmem:[%s5775_s1 + $0x1188] sm:$0xff]  ;;  %v814_v18 = vld [vmem:[%s5775_s1 + $0x11d8] sm:$0xff]  ;;  %v2412_v21 = vpack.c.bf16 %v793_v12, %v783_v11  ;;  %v2350_v22 = vpack.c.bf16 %v494_v15, %v484_v14  ;;  %v483_v23 = vld [vmem:[%s5775_s1 + $0x780] sm:$0xff] }
  0x41   : > { %2399 = vmatprep.subr.bf16.mxu0 %v2398_v40  ;;  %1161 = vmatprep.mubr.f32.mxu1 %v3557_v16  ;;  %v3567_v19 = vld [vmem:[%s3536_s23 + $0x18] sm:$0xff]  ;;  %v493_v24 = vld [vmem:[%s5775_s1 + $0x7d0] sm:$0xff]  ;;  %v803_v25 = vld [vmem:[%s5775_s1 + $0x1180] sm:$0xff]  ;;  %v2414_v26 = vpack.c.bf16 %v814_v18, %v804_v17 }
  0x42   : > { %1232 = vmatprep.mubr.f32.mxu0 %v3567_v19  ;;  %v813_v27 = vld [vmem:[%s5775_s1 + $0x11d0] sm:$0xff]  ;;  %v504_v28 = vld [vmem:[%s5775_s1 + $0x828] sm:$0xff]  ;;  %v514_v29 = vld [vmem:[%s5775_s1 + $0x878] sm:$0xff]  ;;  %v2352_v32 = vpack.c.bf16 %v493_v24, %v483_v23 }
  0x43   : > { %2337 = vmatpush1.bf16.msra.mxu1 %v2336_v46  ;;  %v824_v30 = vld [vmem:[%s5775_s1 + $0x1228] sm:$0xff]  ;;  %v834_v31 = vld [vmem:[%s5775_s1 + $0x1278] sm:$0xff]  ;;  %v2416_v33 = vpack.c.bf16 %v813_v27, %v803_v25  ;;  %v2354_v34 = vpack.c.bf16 %v514_v29, %v504_v28  ;;  %v503_v35 = vld [vmem:[%s5775_s1 + $0x820] sm:$0xff] }
  0x44   : > { %2401 = vmatpush1.bf16.msra.mxu0 %v2400_v47  ;;  %2339 = vmatprep.subr.bf16.mxu1 %v2338_v48  ;;  %v513_v36 = vld [vmem:[%s5775_s1 + $0x870] sm:$0xff]  ;;  %v823_v37 = vld [vmem:[%s5775_s1 + $0x1220] sm:$0xff]  ;;  %v2418_v38 = vpack.c.bf16 %v834_v31, %v824_v30  ;;  %v524_v40 = vld [vmem:[%s5775_s1 + $0x8c8] sm:$0xff] }
  0x45   : > { %2403 = vmatprep.subr.bf16.mxu0 %v2402_v52  ;;  %v833_v39 = vld [vmem:[%s5775_s1 + $0x1270] sm:$0xff]  ;;  %v534_v41 = vld [vmem:[%s5775_s1 + $0x918] sm:$0xff]  ;;  %v844_v42 = vld [vmem:[%s5775_s1 + $0x12c8] sm:$0xff]  ;;  %v2356_v44 = vpack.c.bf16 %v513_v36, %v503_v35 }
  0x46   : > { %v854_v43 = vld [vmem:[%s5775_s1 + $0x1318] sm:$0xff]  ;;  %v2420_v45 = vpack.c.bf16 %v833_v39, %v823_v37  ;;  %v2358_v46 = vpack.c.bf16 %v534_v41, %v524_v40  ;;  %v523_v47 = vld [vmem:[%s5775_s1 + $0x8c0] sm:$0xff]  ;;  %v533_v48 = vld [vmem:[%s5775_s1 + $0x910] sm:$0xff] }
  0x47   : > { %2341 = vmatpush1.bf16.msra.mxu1 %v2340_v58  ;;  %v843_v49 = vld [vmem:[%s5775_s1 + $0x12c0] sm:$0xff]  ;;  %v2422_v50 = vpack.c.bf16 %v854_v43, %v844_v42  ;;  %v853_v51 = vld [vmem:[%s5775_s1 + $0x1310] sm:$0xff]  ;;  %v544_v52 = vld [vmem:[%s5775_s1 + $0x968] sm:$0xff]  ;;  %v2360_v56 = vpack.c.bf16 %v533_v48, %v523_v47  ;;  %v3188_v42 = vmov 0.0  }
  0x48   : > { %2405 = vmatpush1.bf16.msra.mxu0 %v2404_v59  ;;  %2343 = vmatprep.subr.bf16.mxu1 %v2342_v60  ;;  %v554_v53 = vld [vmem:[%s5775_s1 + $0x9b8] sm:$0xff]  ;;  %v864_v54 = vld [vmem:[%s5775_s1 + $0x1368] sm:$0xff]  ;;  %v2424_v57 = vpack.c.bf16 %v853_v51, %v843_v49  ;;  %v543_v59 = vld [vmem:[%s5775_s1 + $0x960] sm:$0xff] }
  0x49   : > { %2407 = vmatprep.subr.bf16.mxu0 %v2406_v0  ;;  %v874_v55 = vld [vmem:[%s5775_s1 + $0x13b8] sm:$0xff]  ;;  %v2362_v58 = vpack.c.bf16 %v554_v53, %v544_v52  ;;  %v553_v60 = vld [vmem:[%s5775_s1 + $0x9b0] sm:$0xff]  ;;  %v863_v61 = vld [vmem:[%s5775_s1 + $0x1360] sm:$0xff] }
  0x4a   : > { %v2426_v62 = vpack.c.bf16 %v874_v55, %v864_v54  ;;  %v873_v63 = vld [vmem:[%s5775_s1 + $0x13b0] sm:$0xff]  ;;  %v246_v0 = vld [vmem:[%s5775_s1 + $0x18] sm:$0xff]  ;;  %v256_v1 = vld [vmem:[%s5775_s1 + $0x68] sm:$0xff]  ;;  %v2364_v4 = vpack.c.bf16 %v553_v60, %v543_v59 }
  0x4b   : > { %2345 = vmatpush1.bf16.msra.mxu1 %v2344_v6  ;;  %v884_v2 = vld [vmem:[%s5775_s1 + $0x1408] sm:$0xff]  ;;  %v894_v3 = vld [vmem:[%s5775_s1 + $0x1458] sm:$0xff]  ;;  %v2428_v5 = vpack.c.bf16 %v873_v63, %v863_v61  ;;  %v2462_v6 = vpack.c.bf16 %v256_v1, %v246_v0  ;;  %v883_v7 = vld [vmem:[%s5775_s1 + $0x1400] sm:$0xff] }
  0x4c   : > { %2409 = vmatpush1.bf16.msra.mxu0 %v2408_v8  ;;  %2347 = vmatprep.subr.bf16.mxu1 %v2346_v9  ;;  %v245_v8 = vld [vmem:[%s5775_s1 + $0x10] sm:$0xff]  ;;  %v255_v9 = vld [vmem:[%s5775_s1 + $0x60] sm:$0xff]  ;;  %v2430_v10 = vpack.c.bf16 %v894_v3, %v884_v2  ;;  %v266_v12 = vld [vmem:[%s5775_s1 + $0xb8] sm:$0xff] }
  0x4d   : > { %2411 = vmatprep.subr.bf16.mxu0 %v2410_v13  ;;  %v893_v11 = vld [vmem:[%s5775_s1 + $0x1450] sm:$0xff]  ;;  %v276_v13 = vld [vmem:[%s5775_s1 + $0x108] sm:$0xff]  ;;  %v914_v15 = vld [vmem:[%s5775_s1 + $0x14f8] sm:$0xff] }
  0x4e   : > { %v904_v14 = vld [vmem:[%s5775_s1 + $0x14a8] sm:$0xff]  ;;  %v3691_v17 = vld [vmem:[%s3536_s23] sm:$0xff]  ;;  %v240_v18 = vld [vmem:[%s3536_s23 + $0x10] sm:$0xff] }
  0x4f   : > { %2349 = vmatpush1.bf16.msra.mxu1 %v2348_v20  ;;  %v2464_v20 = vpack.c.bf16 %v255_v9, %v245_v8  ;;  %v903_v23 = vld [vmem:[%s5775_s1 + $0x14a0] sm:$0xff]  ;;  %v265_v24 = vld [vmem:[%s5775_s1 + $0xb0] sm:$0xff]  ;;  %v286_v28 = vld [vmem:[%s5775_s1 + $0x158] sm:$0xff] }
  0x50   : > { %2413 = vmatpush1.bf16.msra.mxu0 %v2412_v21  ;;  %2351 = vmatprep.subr.bf16.mxu1 %v2350_v22  ;;  %v2432_v21 = vpack.c.bf16 %v893_v11, %v883_v7  ;;  %v2466_v22 = vpack.c.bf16 %v276_v13, %v266_v12  ;;  %v275_v25 = vld [vmem:[%s5775_s1 + $0x100] sm:$0xff]  ;;  %v913_v27 = vld [vmem:[%s5775_s1 + $0x14f0] sm:$0xff]  ;;  %v296_v29 = vld [vmem:[%s5775_s1 + $0x1a8] sm:$0xff] }
  0x51   : > { %2415 = vmatprep.subr.bf16.mxu0 %v2414_v26  ;;  %v2434_v26 = vpack.c.bf16 %v914_v15, %v904_v14  ;;  %v924_v30 = vld [vmem:[%s5775_s1 + $0x1548] sm:$0xff]  ;;  %v934_v31 = vld [vmem:[%s5775_s1 + $0x1598] sm:$0xff]  ;;  %v923_v35 = vld [vmem:[%s5775_s1 + $0x1540] sm:$0xff] }
  0x52   : > { %v285_v36 = vld [vmem:[%s5775_s1 + $0x150] sm:$0xff]  ;;  %v295_v37 = vld [vmem:[%s5775_s1 + $0x1a0] sm:$0xff]  ;;  %v306_v40 = vld [vmem:[%s5775_s1 + $0x1f8] sm:$0xff] }
  0x53   : > { %2353 = vmatpush1.bf16.msra.mxu1 %v2352_v32  ;;  %v2468_v32 = vpack.c.bf16 %v275_v25, %v265_v24  ;;  %v933_v39 = vld [vmem:[%s5775_s1 + $0x1590] sm:$0xff]  ;;  %v316_v41 = vld [vmem:[%s5775_s1 + $0x248] sm:$0xff]  ;;  %v943_v48 = vld [vmem:[%s5775_s1 + $0x15e0] sm:$0xff] }
  0x54   : > { %2417 = vmatpush1.bf16.msra.mxu0 %v2416_v33  ;;  %2355 = vmatprep.subr.bf16.mxu1 %v2354_v34  ;;  %v2436_v33 = vpack.c.bf16 %v913_v27, %v903_v23  ;;  %v2470_v34 = vpack.c.bf16 %v296_v29, %v286_v28  ;;  %v944_v43 = vld [vmem:[%s5775_s1 + $0x15e8] sm:$0xff]  ;;  %v2474_v47 = vpack.c.bf16 %v316_v41, %v306_v40  ;;  %v305_v49 = vld [vmem:[%s5775_s1 + $0x1f0] sm:$0xff]  ;;  %v326_v53 = vld [vmem:[%s5775_s1 + $0x298] sm:$0xff] }
  0x55   : > { %2419 = vmatprep.subr.bf16.mxu0 %v2418_v38  ;;  %v2438_v38 = vpack.c.bf16 %v934_v31, %v924_v30  ;;  %v953_v52 = vld [vmem:[%s5775_s1 + $0x1630] sm:$0xff]  ;;  %v336_v54 = vld [vmem:[%s5775_s1 + $0x2e8] sm:$0xff]  ;;  %v963_v60 = vld [vmem:[%s5775_s1 + $0x1680] sm:$0xff] }
  0x56   : > { %v964_v55 = vld [vmem:[%s5775_s1 + $0x1688] sm:$0xff]  ;;  %v2478_v59 = vpack.c.bf16 %v336_v54, %v326_v53  ;;  %v325_v61 = vld [vmem:[%s5775_s1 + $0x290] sm:$0xff]  ;;  %v346_v1 = vld [vmem:[%s5775_s1 + $0x338] sm:$0xff] }
  0x57   : > { %2357 = vmatpush1.bf16.msra.mxu1 %v2356_v44  ;;  %v954_v44 = vld [vmem:[%s5775_s1 + $0x1638] sm:$0xff]  ;;  %v973_v0 = vld [vmem:[%s5775_s1 + $0x16d0] sm:$0xff]  ;;  %v356_v2 = vld [vmem:[%s5775_s1 + $0x388] sm:$0xff] }
  0x58   : > { %2421 = vmatpush1.bf16.msra.mxu0 %v2420_v45  ;;  %2359 = vmatprep.subr.bf16.mxu1 %v2358_v46  ;;  %v2472_v45 = vpack.c.bf16 %v295_v37, %v285_v36  ;;  %v2440_v46 = vpack.c.bf16 %v933_v39, %v923_v35  ;;  %v2442_v51 = vpack.c.bf16 %v954_v44, %v944_v43  ;;  %v984_v3 = vld [vmem:[%s5775_s1 + $0x1728] sm:$0xff]  ;;  %v983_v8 = vld [vmem:[%s5775_s1 + $0x1720] sm:$0xff]  ;;  %v345_v9 = vld [vmem:[%s5775_s1 + $0x330] sm:$0xff] }
  0x59   : > { %2423 = vmatprep.subr.bf16.mxu0 %v2422_v50  ;;  %v315_v50 = vld [vmem:[%s5775_s1 + $0x240] sm:$0xff]  ;;  %v2482_v7 = vpack.c.bf16 %v356_v2, %v346_v1  ;;  %v993_v12 = vld [vmem:[%s5775_s1 + $0x1770] sm:$0xff]  ;;  %v366_v13 = vld [vmem:[%s5775_s1 + $0x3d8] sm:$0xff] }
  0x5a   : > { %v376_v14 = vld [vmem:[%s5775_s1 + $0x428] sm:$0xff]  ;;  %v1003_v23 = vld [vmem:[%s5775_s1 + $0x17c0] sm:$0xff]  ;;  %v365_v24 = vld [vmem:[%s5775_s1 + $0x3d0] sm:$0xff] }
  0x5b   : > { %2361 = vmatpush1.bf16.msra.mxu1 %v2360_v56  ;;  %v974_v56 = vld [vmem:[%s5775_s1 + $0x16d8] sm:$0xff]  ;;  %v1004_v15 = vld [vmem:[%s5775_s1 + $0x17c8] sm:$0xff]  ;;  %v375_v25 = vld [vmem:[%s5775_s1 + $0x420] sm:$0xff] }
  0x5c   : > { %2425 = vmatpush1.bf16.msra.mxu0 %v2424_v57  ;;  %2363 = vmatprep.subr.bf16.mxu1 %v2362_v58  ;;  %v2476_v57 = vpack.c.bf16 %v315_v50, %v305_v49  ;;  %v2444_v58 = vpack.c.bf16 %v953_v52, %v943_v48  ;;  %v2446_v63 = vpack.c.bf16 %v974_v56, %v964_v55  ;;  %v1013_v27 = vld [vmem:[%s5775_s1 + $0x1810] sm:$0xff]  ;;  %v386_v28 = vld [vmem:[%s5775_s1 + $0x478] sm:$0xff]  ;;  %v396_v29 = vld [vmem:[%s5775_s1 + $0x4c8] sm:$0xff] }
  0x5d   : > { %2427 = vmatprep.subr.bf16.mxu0 %v2426_v62  ;;  %v335_v62 = vld [vmem:[%s5775_s1 + $0x2e0] sm:$0xff]  ;;  %v1024_v30 = vld [vmem:[%s5775_s1 + $0x1868] sm:$0xff]  ;;  %v1034_v31 = vld [vmem:[%s5775_s1 + $0x18b8] sm:$0xff] }
  0x5e   : > { %v1023_v35 = vld [vmem:[%s5775_s1 + $0x1860] sm:$0xff]  ;;  %v385_v36 = vld [vmem:[%s5775_s1 + $0x470] sm:$0xff]  ;;  %v406_v40 = vld [vmem:[%s5775_s1 + $0x518] sm:$0xff] }
  0x5f   : > { %2365 = vmatpush1.bf16.msra.mxu1 %v2364_v4  ;;  %v994_v4 = vld [vmem:[%s5775_s1 + $0x1778] sm:$0xff]  ;;  %v395_v37 = vld [vmem:[%s5775_s1 + $0x4c0] sm:$0xff]  ;;  %v1033_v39 = vld [vmem:[%s5775_s1 + $0x18b0] sm:$0xff] }
  0x60   : > { %2429 = vmatpush1.bf16.msra.mxu0 %v2428_v5  ;;  %2463 = vmatprep.subr.bf16.mxu1 %v2462_v6  ;;  %v2480_v5 = vpack.c.bf16 %v335_v62, %v325_v61  ;;  %v2448_v6 = vpack.c.bf16 %v973_v0, %v963_v60  ;;  %v2450_v11 = vpack.c.bf16 %v994_v4, %v984_v3  ;;  %v416_v41 = vld [vmem:[%s5775_s1 + $0x568] sm:$0xff]  ;;  %v258_v44 = vld [vmem:[%s5775_s1 + $0x78] sm:$0xff]  ;;  %v405_v48 = vld [vmem:[%s5775_s1 + $0x510] sm:$0xff] }
  0x61   : > { %2431 = vmatprep.subr.bf16.mxu0 %v2430_v10  ;;  %v355_v10 = vld [vmem:[%s5775_s1 + $0x380] sm:$0xff]  ;;  %v248_v43 = vld [vmem:[%s5775_s1 + $0x28] sm:$0xff]  ;;  %v257_v52 = vld [vmem:[%s5775_s1 + $0x70] sm:$0xff] }
  0x62   : > { %1162 = vmatmul.mubr.f32.vlgmr.msra.gmra.mrb[0].mxu1 %v3691_v17  ;;  %v415_v49 = vld [vmem:[%s5775_s1 + $0x560] sm:$0xff]  ;;  %v426_v53 = vld [vmem:[%s5775_s1 + $0x5b8] sm:$0xff]  ;;  %v436_v54 = vld [vmem:[%s5775_s1 + $0x608] sm:$0xff] }
  0x63   : > { %1233 = vmatmul.mubr.f32.vlgmr.msra.gmra.mrb[0].mxu0 %v240_v18  ;;  %2465 = vmatpush1.bf16.msra.mxu1 %v2464_v20  ;;  %v1014_v18 = vld [vmem:[%s5775_s1 + $0x1818] sm:$0xff]  ;;  %v2484_v20 = vpack.c.bf16 %v355_v10, %v345_v9  ;;  %v247_v50 = vld [vmem:[%s5775_s1 + $0x20] sm:$0xff]  ;;  %v268_v55 = vld [vmem:[%s5775_s1 + $0xc8] sm:$0xff]  ;;  %v2498_v60 = vpack.c.bf16 %v436_v54, %v426_v53 }
  0x64   : > { %2433 = vmatpush1.bf16.msra.mxu0 %v2432_v21  ;;  %2467 = vmatprep.subr.bf16.mxu1 %v2466_v22  ;;  %v2452_v21 = vpack.c.bf16 %v993_v12, %v983_v8  ;;  %v2486_v22 = vpack.c.bf16 %v376_v14, %v366_v13  ;;  %v278_v56 = vld [vmem:[%s5775_s1 + $0x118] sm:$0xff]  ;;  %v425_v61 = vld [vmem:[%s5775_s1 + $0x5b0] sm:$0xff]  ;;  %v435_v62 = vld [vmem:[%s5775_s1 + $0x600] sm:$0xff] }
  0x65   : > { %2435 = vmatprep.subr.bf16.mxu0 %v2434_v26  ;;  %1303 = vmatprep.mubr.f32.mxu0 %v3188_v42  ;;  %v2454_v26 = vpack.c.bf16 %v1014_v18, %v1004_v15  ;;  %v2626_v0 = vpack.c.bf16 %v278_v56, %v268_v55  ;;  %v277_v1 = vld [vmem:[%s5775_s1 + $0x110] sm:$0xff]  ;;  %v446_v2 = vld [vmem:[%s5775_s1 + $0x658] sm:$0xff]  ;;  %v456_v3 = vld [vmem:[%s5775_s1 + $0x6a8] sm:$0xff] }
  0x66   : > { %1374 = vmatprep.mubr.f32.mxu1 %v3557_v16  ;;  %v288_v4 = vld [vmem:[%s5775_s1 + $0x168] sm:$0xff]  ;;  %v2502_v8 = vpack.c.bf16 %v456_v3, %v446_v2  ;;  %v445_v9 = vld [vmem:[%s5775_s1 + $0x650] sm:$0xff]  ;;  %v455_v10 = vld [vmem:[%s5775_s1 + $0x6a0] sm:$0xff] }
  0x67   : > { %2469 = vmatpush1.bf16.msra.mxu1 %v2468_v32  ;;  %v2488_v32 = vpack.c.bf16 %v375_v25, %v365_v24  ;;  %v297_v13 = vld [vmem:[%s5775_s1 + $0x1b0] sm:$0xff]  ;;  %v466_v14 = vld [vmem:[%s5775_s1 + $0x6f8] sm:$0xff]  ;;  %v476_v15 = vld [vmem:[%s5775_s1 + $0x748] sm:$0xff] }
  0x68   : > { %2437 = vmatpush1.bf16.msra.mxu0 %v2436_v33  ;;  %2471 = vmatprep.subr.bf16.mxu1 %v2470_v34  ;;  %v2456_v33 = vpack.c.bf16 %v1013_v27, %v1003_v23  ;;  %v2490_v34 = vpack.c.bf16 %v396_v29, %v386_v28  ;;  %v308_v18 = vld [vmem:[%s5775_s1 + $0x208] sm:$0xff]  ;;  %v2506_v23 = vpack.c.bf16 %v476_v15, %v466_v14  ;;  %v465_v24 = vld [vmem:[%s5775_s1 + $0x6f0] sm:$0xff]  ;;  %v307_v25 = vld [vmem:[%s5775_s1 + $0x200] sm:$0xff] }
  0x69   : > { %2439 = vmatprep.subr.bf16.mxu0 %v2438_v38  ;;  %v2458_v38 = vpack.c.bf16 %v1034_v31, %v1024_v30  ;;  %v317_v27 = vld [vmem:[%s5775_s1 + $0x250] sm:$0xff]  ;;  %v486_v28 = vld [vmem:[%s5775_s1 + $0x798] sm:$0xff]  ;;  %v496_v29 = vld [vmem:[%s5775_s1 + $0x7e8] sm:$0xff] }
  0x6a   : > { %v328_v30 = vld [vmem:[%s5775_s1 + $0x2a8] sm:$0xff]  ;;  %v338_v31 = vld [vmem:[%s5775_s1 + $0x2f8] sm:$0xff] }
  0x6b   : > { %2473 = vmatpush1.bf16.msra.mxu1 %v2472_v45  ;;  %v2492_v45 = vpack.c.bf16 %v395_v37, %v385_v36  ;;  %v495_v36 = vld [vmem:[%s5775_s1 + $0x7e0] sm:$0xff]  ;;  %v526_v53 = vld [vmem:[%s5775_s1 + $0x8d8] sm:$0xff]  ;;  %v536_v54 = vld [vmem:[%s5775_s1 + $0x928] sm:$0xff] }
  0x6c   : > { %2441 = vmatpush1.bf16.msra.mxu0 %v2440_v46  ;;  %2475 = vmatprep.subr.bf16.mxu1 %v2474_v47  ;;  %v2460_v46 = vpack.c.bf16 %v1033_v39, %v1023_v35  ;;  %v2494_v47 = vpack.c.bf16 %v416_v41, %v406_v40  ;;  %v485_v35 = vld [vmem:[%s5775_s1 + $0x790] sm:$0xff]  ;;  %v327_v37 = vld [vmem:[%s5775_s1 + $0x2a0] sm:$0xff]  ;;  %v506_v40 = vld [vmem:[%s5775_s1 + $0x838] sm:$0xff] }
  0x6d   : > { %2443 = vmatprep.subr.bf16.mxu0 %v2442_v51  ;;  %v2622_v51 = vpack.c.bf16 %v258_v44, %v248_v43  ;;  %v337_v39 = vld [vmem:[%s5775_s1 + $0x2f0] sm:$0xff]  ;;  %v516_v41 = vld [vmem:[%s5775_s1 + $0x888] sm:$0xff]  ;;  %v358_v44 = vld [vmem:[%s5775_s1 + $0x398] sm:$0xff] }
  0x6e   : > { %v348_v43 = vld [vmem:[%s5775_s1 + $0x348] sm:$0xff]  ;;  %v378_v56 = vld [vmem:[%s5775_s1 + $0x438] sm:$0xff] }
  0x6f   : > { %2477 = vmatpush1.bf16.msra.mxu1 %v2476_v57  ;;  %v242_v57 = vld [vmem:[%s3536_s23 + $0x20] sm:$0xff]  ;;  %v368_v55 = vld [vmem:[%s5775_s1 + $0x3e8] sm:$0xff] }
  0x70   : > { %2445 = vmatpush1.bf16.msra.mxu0 %v2444_v58  ;;  %2479 = vmatprep.subr.bf16.mxu1 %v2478_v59  ;;  %v2496_v58 = vpack.c.bf16 %v415_v49, %v405_v48  ;;  %v2624_v59 = vpack.c.bf16 %v257_v52, %v247_v50  ;;  %v505_v48 = vld [vmem:[%s5775_s1 + $0x830] sm:$0xff]  ;;  %v515_v49 = vld [vmem:[%s5775_s1 + $0x880] sm:$0xff]  ;;  %v556_v2 = vld [vmem:[%s5775_s1 + $0x9c8] sm:$0xff] }
  0x71   : > { %2447 = vmatprep.subr.bf16.mxu0 %v2446_v63  ;;  %v267_v63 = vld [vmem:[%s5775_s1 + $0xc0] sm:$0xff]  ;;  %v357_v52 = vld [vmem:[%s5775_s1 + $0x390] sm:$0xff]  ;;  %v388_v3 = vld [vmem:[%s5775_s1 + $0x488] sm:$0xff] }
  0x72   : > { %v347_v50 = vld [vmem:[%s5775_s1 + $0x340] sm:$0xff]  ;;  %v576_v14 = vld [vmem:[%s5775_s1 + $0xa68] sm:$0xff] }
  0x73   : > { %2481 = vmatpush1.bf16.msra.mxu1 %v2480_v5  ;;  %v298_v5 = vld [vmem:[%s5775_s1 + $0x1b8] sm:$0xff]  ;;  %v408_v15 = vld [vmem:[%s5775_s1 + $0x528] sm:$0xff] }
  0x74   : > { %2449 = vmatpush1.bf16.msra.mxu0 %v2448_v6  ;;  %2483 = vmatprep.subr.bf16.mxu1 %v2482_v7  ;;  %v2500_v6 = vpack.c.bf16 %v435_v62, %v425_v61  ;;  %v2628_v7 = vpack.c.bf16 %v277_v1, %v267_v63  ;;  %v2630_v12 = vpack.c.bf16 %v298_v5, %v288_v4  ;;  %v535_v61 = vld [vmem:[%s5775_s1 + $0x920] sm:$0xff]  ;;  %v546_v1 = vld [vmem:[%s5775_s1 + $0x978] sm:$0xff] }
  0x75   : > { %2451 = vmatprep.subr.bf16.mxu0 %v2450_v11  ;;  %v287_v11 = vld [vmem:[%s5775_s1 + $0x160] sm:$0xff]  ;;  %v2646_v63 = vpack.c.bf16 %v378_v56, %v368_v55  ;;  %v398_v4 = vld [vmem:[%s5775_s1 + $0x4d8] sm:$0xff] }
  0x76   : > { %v367_v62 = vld [vmem:[%s5775_s1 + $0x3e0] sm:$0xff]  ;;  %v478_v55 = vld [vmem:[%s5775_s1 + $0x758] sm:$0xff] }
  0x77   : > { %2485 = vmatpush1.bf16.msra.mxu1 %v2484_v20  ;;  %v318_v20 = vld [vmem:[%s5775_s1 + $0x258] sm:$0xff] }
  0x78   : > { %2453 = vmatpush1.bf16.msra.mxu0 %v2452_v21  ;;  %2487 = vmatprep.subr.bf16.mxu1 %v2486_v22  ;;  %v2504_v21 = vpack.c.bf16 %v455_v10, %v445_v9  ;;  %v2632_v22 = vpack.c.bf16 %v297_v13, %v287_v11  ;;  %v555_v9 = vld [vmem:[%s5775_s1 + $0x9c0] sm:$0xff]  ;;  %v2650_v11 = vpack.c.bf16 %v398_v4, %v388_v3  ;;  %v566_v13 = vld [vmem:[%s5775_s1 + $0xa18] sm:$0xff] }
  0x79   : > { %2455 = vmatprep.subr.bf16.mxu0 %v2454_v26  ;;  %v2634_v26 = vpack.c.bf16 %v318_v20, %v308_v18  ;;  %v387_v10 = vld [vmem:[%s5775_s1 + $0x480] sm:$0xff]  ;;  %v418_v18 = vld [vmem:[%s5775_s1 + $0x578] sm:$0xff] }
  0x7a   : > { %v498_v3 = vld [vmem:[%s5775_s1 + $0x7f8] sm:$0xff] }
  0x7b   : > { %2489 = vmatpush1.bf16.msra.mxu1 %v2488_v32 }
  0x7c   : > { %2457 = vmatpush1.bf16.msra.mxu0 %v2456_v33  ;;  %2491 = vmatprep.subr.bf16.mxu1 %v2490_v34  ;;  %v2636_v33 = vpack.c.bf16 %v317_v27, %v307_v25  ;;  %v2510_v34 = vpack.c.bf16 %v496_v29, %v486_v28  ;;  %v2654_v25 = vpack.c.bf16 %v418_v18, %v408_v15  ;;  %v586_v27 = vld [vmem:[%s5775_s1 + $0xab8] sm:$0xff]  ;;  %v596_v28 = vld [vmem:[%s5775_s1 + $0xb08] sm:$0xff] }
  0x7d   : > { %2459 = vmatprep.subr.bf16.mxu0 %v2458_v38  ;;  %v2638_v38 = vpack.c.bf16 %v338_v31, %v328_v30  ;;  %v428_v29 = vld [vmem:[%s5775_s1 + $0x5c8] sm:$0xff]  ;;  %v438_v30 = vld [vmem:[%s5775_s1 + $0x618] sm:$0xff] }
  0x7e   : > { %v518_v15 = vld [vmem:[%s5775_s1 + $0x898] sm:$0xff] }
  0x7f   : > { %2493 = vmatpush1.bf16.msra.mxu1 %v2492_v45  ;;  %v2512_v45 = vpack.c.bf16 %v495_v36, %v485_v35  ;;  %v595_v35 = vld [vmem:[%s5775_s1 + $0xb00] sm:$0xff] }
  0x80   : > { %2461 = vmatpush1.bf16.msra.mxu0 %v2460_v46  ;;  %2495 = vmatprep.subr.bf16.mxu1 %v2494_v47  ;;  %v2640_v46 = vpack.c.bf16 %v337_v39, %v327_v37  ;;  %v2514_v47 = vpack.c.bf16 %v516_v41, %v506_v40  ;;  %v427_v36 = vld [vmem:[%s5775_s1 + $0x5c0] sm:$0xff]  ;;  %v2658_v37 = vpack.c.bf16 %v438_v30, %v428_v29  ;;  %v606_v39 = vld [vmem:[%s5775_s1 + $0xb58] sm:$0xff]  ;;  %v616_v40 = vld [vmem:[%s5775_s1 + $0xba8] sm:$0xff] }
  0x81   : > { %2623 = vmatprep.subr.bf16.mxu0 %v2622_v51  ;;  %v2642_v51 = vpack.c.bf16 %v358_v44, %v348_v43  ;;  %v448_v41 = vld [vmem:[%s5775_s1 + $0x668] sm:$0xff]  ;;  %v458_v43 = vld [vmem:[%s5775_s1 + $0x6b8] sm:$0xff] }
  0x82   : > { %v538_v29 = vld [vmem:[%s5775_s1 + $0x938] sm:$0xff] }
  0x83   : > { %1304 = vmatmul.mubr.f32.vlgmr.msra.gmra.mrb[0].mxu0 %v242_v57  ;;  %2497 = vmatpush1.bf16.msra.mxu1 %v2496_v58  ;;  %v2516_v57 = vpack.c.bf16 %v515_v49, %v505_v48  ;;  %v2644_v58 = vpack.c.bf16 %v357_v52, %v347_v50  ;;  %v615_v48 = vld [vmem:[%s5775_s1 + $0xba0] sm:$0xff]  ;;  %v2662_v50 = vpack.c.bf16 %v458_v43, %v448_v41  ;;  %v626_v52 = vld [vmem:[%s5775_s1 + $0xbf8] sm:$0xff] }
  0x84   : > { %2625 = vmatpush1.bf16.msra.mxu0 %v2624_v59  ;;  %2499 = vmatprep.subr.bf16.mxu1 %v2498_v60  ;;  %v2518_v59 = vpack.c.bf16 %v536_v54, %v526_v53  ;;  %v525_v60 = vld [vmem:[%s5775_s1 + $0x8d0] sm:$0xff]  ;;  %v447_v49 = vld [vmem:[%s5775_s1 + $0x660] sm:$0xff]  ;;  %v636_v53 = vld [vmem:[%s5775_s1 + $0xc48] sm:$0xff] }
  0x85   : > { %2627 = vmatprep.subr.bf16.mxu0 %v2626_v0  ;;  %1587 = vmatprep.mubr.f32.mxu0 %v3557_v16  ;;  %v475_v16 = vld [vmem:[%s5775_s1 + $0x740] sm:$0xff]  ;;  %v377_v0 = vld [vmem:[%s5775_s1 + $0x430] sm:$0xff]  ;;  %v2520_v5 = vpack.c.bf16 %v535_v61, %v525_v60  ;;  %v468_v54 = vld [vmem:[%s5775_s1 + $0x708] sm:$0xff] }
  0x86   : > { %v2508_v32 = vpack.c.bf16 %v475_v16, %v465_v24  ;;  %v575_v24 = vld [vmem:[%s5775_s1 + $0xa60] sm:$0xff]  ;;  %v558_v41 = vld [vmem:[%s5775_s1 + $0x9d8] sm:$0xff] }
  0x87   : > { %2501 = vmatpush1.bf16.msra.mxu1 %v2500_v6  ;;  %v2648_v6 = vpack.c.bf16 %v377_v0, %v367_v62  ;;  %v407_v16 = vld [vmem:[%s5775_s1 + $0x520] sm:$0xff]  ;;  %v2666_v62 = vpack.c.bf16 %v478_v55, %v468_v54  ;;  %v646_v0 = vld [vmem:[%s5775_s1 + $0xc98] sm:$0xff] }
  0x88   : > { %2629 = vmatpush1.bf16.msra.mxu0 %v2628_v7  ;;  %2503 = vmatprep.subr.bf16.mxu1 %v2502_v8  ;;  %v2522_v7 = vpack.c.bf16 %v556_v2, %v546_v1  ;;  %v545_v8 = vld [vmem:[%s5775_s1 + $0x970] sm:$0xff]  ;;  %v635_v60 = vld [vmem:[%s5775_s1 + $0xc40] sm:$0xff]  ;;  %v656_v1 = vld [vmem:[%s5775_s1 + $0xce8] sm:$0xff] }
  0x89   : > { %2631 = vmatprep.subr.bf16.mxu0 %v2630_v12  ;;  %v397_v12 = vld [vmem:[%s5775_s1 + $0x4d0] sm:$0xff]  ;;  %v2524_v20 = vpack.c.bf16 %v555_v9, %v545_v8  ;;  %v467_v61 = vld [vmem:[%s5775_s1 + $0x700] sm:$0xff]  ;;  %v488_v2 = vld [vmem:[%s5775_s1 + $0x7a8] sm:$0xff] }
  0x8a   : > { %v655_v8 = vld [vmem:[%s5775_s1 + $0xce0] sm:$0xff]  ;;  %v578_v54 = vld [vmem:[%s5775_s1 + $0xa78] sm:$0xff] }
  0x8b   : > { %2505 = vmatpush1.bf16.msra.mxu1 %v2504_v21  ;;  %v2652_v21 = vpack.c.bf16 %v397_v12, %v387_v10  ;;  %v487_v9 = vld [vmem:[%s5775_s1 + $0x7a0] sm:$0xff]  ;;  %v2670_v10 = vpack.c.bf16 %v498_v3, %v488_v2  ;;  %v666_v12 = vld [vmem:[%s5775_s1 + $0xd38] sm:$0xff] }
  0x8c   : > { %2633 = vmatpush1.bf16.msra.mxu0 %v2632_v22  ;;  %2507 = vmatprep.subr.bf16.mxu1 %v2506_v23  ;;  %v2526_v22 = vpack.c.bf16 %v576_v14, %v566_v13  ;;  %v565_v23 = vld [vmem:[%s5775_s1 + $0xa10] sm:$0xff]  ;;  %v676_v13 = vld [vmem:[%s5775_s1 + $0xd88] sm:$0xff]  ;;  %v598_v2 = vld [vmem:[%s5775_s1 + $0xb18] sm:$0xff] }
  0x8d   : > { %2635 = vmatprep.subr.bf16.mxu0 %v2634_v26  ;;  %v417_v26 = vld [vmem:[%s5775_s1 + $0x570] sm:$0xff]  ;;  %v2528_v31 = vpack.c.bf16 %v575_v24, %v565_v23  ;;  %v508_v14 = vld [vmem:[%s5775_s1 + $0x848] sm:$0xff]  ;;  %v675_v23 = vld [vmem:[%s5775_s1 + $0xd80] sm:$0xff] }
  0x8e   : > { %v507_v24 = vld [vmem:[%s5775_s1 + $0x840] sm:$0xff] }
  0x8f   : > { %2509 = vmatpush1.bf16.msra.mxu1 %v2508_v32  ;;  %v2656_v32 = vpack.c.bf16 %v417_v26, %v407_v16  ;;  %v2674_v16 = vpack.c.bf16 %v518_v15, %v508_v14  ;;  %v686_v26 = vld [vmem:[%s5775_s1 + $0xdd8] sm:$0xff] }
  0x90   : > { %2637 = vmatpush1.bf16.msra.mxu0 %v2636_v33  ;;  %2511 = vmatprep.subr.bf16.mxu1 %v2510_v34  ;;  %v2530_v33 = vpack.c.bf16 %v596_v28, %v586_v27  ;;  %v585_v34 = vld [vmem:[%s5775_s1 + $0xab0] sm:$0xff]  ;;  %v696_v27 = vld [vmem:[%s5775_s1 + $0xe28] sm:$0xff]  ;;  %v618_v14 = vld [vmem:[%s5775_s1 + $0xbb8] sm:$0xff] }
  0x91   : > { %2639 = vmatprep.subr.bf16.mxu0 %v2638_v38  ;;  %v437_v38 = vld [vmem:[%s5775_s1 + $0x610] sm:$0xff]  ;;  %v2532_v44 = vpack.c.bf16 %v595_v35, %v585_v34  ;;  %v528_v28 = vld [vmem:[%s5775_s1 + $0x8e8] sm:$0xff]  ;;  %v695_v34 = vld [vmem:[%s5775_s1 + $0xe20] sm:$0xff] }
  0x92   : > { %v527_v35 = vld [vmem:[%s5775_s1 + $0x8e0] sm:$0xff] }
  0x93   : > { %2513 = vmatpush1.bf16.msra.mxu1 %v2512_v45  ;;  %v2660_v45 = vpack.c.bf16 %v437_v38, %v427_v36  ;;  %v2678_v36 = vpack.c.bf16 %v538_v29, %v528_v28  ;;  %v706_v38 = vld [vmem:[%s5775_s1 + $0xe78] sm:$0xff] }
  0x94   : > { %2641 = vmatpush1.bf16.msra.mxu0 %v2640_v46  ;;  %2515 = vmatprep.subr.bf16.mxu1 %v2514_v47  ;;  %v2534_v46 = vpack.c.bf16 %v616_v40, %v606_v39  ;;  %v605_v47 = vld [vmem:[%s5775_s1 + $0xb50] sm:$0xff]  ;;  %v716_v39 = vld [vmem:[%s5775_s1 + $0xec8] sm:$0xff] }
  0x95   : > { %2643 = vmatprep.subr.bf16.mxu0 %v2642_v51  ;;  %v457_v51 = vld [vmem:[%s5775_s1 + $0x6b0] sm:$0xff]  ;;  %v2536_v56 = vpack.c.bf16 %v615_v48, %v605_v47  ;;  %v548_v40 = vld [vmem:[%s5775_s1 + $0x988] sm:$0xff]  ;;  %v715_v47 = vld [vmem:[%s5775_s1 + $0xec0] sm:$0xff] }
  0x96   : > { %v547_v48 = vld [vmem:[%s5775_s1 + $0x980] sm:$0xff] }
  0x97   : > { %2517 = vmatpush1.bf16.msra.mxu1 %v2516_v57  ;;  %v2664_v57 = vpack.c.bf16 %v457_v51, %v447_v49  ;;  %v2682_v49 = vpack.c.bf16 %v558_v41, %v548_v40  ;;  %v726_v51 = vld [vmem:[%s5775_s1 + $0xf18] sm:$0xff] }
  0x98   : > { %2645 = vmatpush1.bf16.msra.mxu0 %v2644_v58  ;;  %2519 = vmatprep.subr.bf16.mxu1 %v2518_v59  ;;  %v2538_v58 = vpack.c.bf16 %v636_v53, %v626_v52  ;;  %v625_v59 = vld [vmem:[%s5775_s1 + $0xbf0] sm:$0xff]  ;;  %v736_v52 = vld [vmem:[%s5775_s1 + $0xf68] sm:$0xff] }
  0x99   : > { %2647 = vmatprep.subr.bf16.mxu0 %v2646_v63  ;;  %v477_v63 = vld [vmem:[%s5775_s1 + $0x750] sm:$0xff]  ;;  %v2540_v4 = vpack.c.bf16 %v635_v60, %v625_v59  ;;  %v568_v53 = vld [vmem:[%s5775_s1 + $0xa28] sm:$0xff]  ;;  %v735_v59 = vld [vmem:[%s5775_s1 + $0xf60] sm:$0xff] }
  0x9a   : > { %v567_v60 = vld [vmem:[%s5775_s1 + $0xa20] sm:$0xff] }
  0x9b   : > { %2521 = vmatpush1.bf16.msra.mxu1 %v2520_v5  ;;  %v2668_v5 = vpack.c.bf16 %v477_v63, %v467_v61  ;;  %v2686_v61 = vpack.c.bf16 %v578_v54, %v568_v53  ;;  %v746_v63 = vld [vmem:[%s5775_s1 + $0xfb8] sm:$0xff] }
  0x9c   : > { %2649 = vmatpush1.bf16.msra.mxu0 %v2648_v6  ;;  %2523 = vmatprep.subr.bf16.mxu1 %v2522_v7  ;;  %v2542_v6 = vpack.c.bf16 %v656_v1, %v646_v0  ;;  %v645_v7 = vld [vmem:[%s5775_s1 + $0xc90] sm:$0xff]  ;;  %v756_v0 = vld [vmem:[%s5775_s1 + $0x1008] sm:$0xff] }
  0x9d   : > { %2651 = vmatprep.subr.bf16.mxu0 %v2650_v11  ;;  %v497_v11 = vld [vmem:[%s5775_s1 + $0x7f0] sm:$0xff]  ;;  %v2544_v18 = vpack.c.bf16 %v655_v8, %v645_v7  ;;  %v588_v1 = vld [vmem:[%s5775_s1 + $0xac8] sm:$0xff]  ;;  %v755_v7 = vld [vmem:[%s5775_s1 + $0x1000] sm:$0xff] }
  0x9e   : > { %v587_v8 = vld [vmem:[%s5775_s1 + $0xac0] sm:$0xff] }
  0x9f   : > { %2525 = vmatpush1.bf16.msra.mxu1 %v2524_v20  ;;  %v2672_v20 = vpack.c.bf16 %v497_v11, %v487_v9  ;;  %v2690_v9 = vpack.c.bf16 %v598_v2, %v588_v1  ;;  %v766_v11 = vld [vmem:[%s5775_s1 + $0x1058] sm:$0xff] }
  0xa0   : > { %2653 = vmatpush1.bf16.msra.mxu0 %v2652_v21  ;;  %2527 = vmatprep.subr.bf16.mxu1 %v2526_v22  ;;  %v2546_v21 = vpack.c.bf16 %v676_v13, %v666_v12  ;;  %v665_v22 = vld [vmem:[%s5775_s1 + $0xd30] sm:$0xff]  ;;  %v776_v12 = vld [vmem:[%s5775_s1 + $0x10a8] sm:$0xff] }
  0xa1   : > { %2655 = vmatprep.subr.bf16.mxu0 %v2654_v25  ;;  %v517_v25 = vld [vmem:[%s5775_s1 + $0x890] sm:$0xff]  ;;  %v2548_v30 = vpack.c.bf16 %v675_v23, %v665_v22  ;;  %v608_v13 = vld [vmem:[%s5775_s1 + $0xb68] sm:$0xff]  ;;  %v775_v22 = vld [vmem:[%s5775_s1 + $0x10a0] sm:$0xff] }
  0xa2   : > { %1375 = vmatmul.mubr.f32.vlgmr.msra.gmra.mrb[2].mxu1 %v3691_v17  ;;  %v607_v23 = vld [vmem:[%s5775_s1 + $0xb60] sm:$0xff] }
  0xa3   : > { %2529 = vmatpush1.bf16.msra.mxu1 %v2528_v31  ;;  %1445 = vmatprep.mubr.f32.mxu1 %v3567_v19  ;;  %v2676_v31 = vpack.c.bf16 %v517_v25, %v507_v24  ;;  %v2694_v24 = vpack.c.bf16 %v618_v14, %v608_v13  ;;  %v796_v25 = vld [vmem:[%s5775_s1 + $0x1148] sm:$0xff] }
  0xa4   : > { %2657 = vmatpush1.bf16.msra.mxu0 %v2656_v32  ;;  %2531 = vmatprep.subr.bf16.mxu1 %v2530_v33  ;;  %v2550_v32 = vpack.c.bf16 %v696_v27, %v686_v26  ;;  %v685_v33 = vld [vmem:[%s5775_s1 + $0xdd0] sm:$0xff]  ;;  %v628_v26 = vld [vmem:[%s5775_s1 + $0xc08] sm:$0xff]  ;;  %v638_v27 = vld [vmem:[%s5775_s1 + $0xc58] sm:$0xff] }
  0xa5   : > { %2659 = vmatprep.subr.bf16.mxu0 %v2658_v37  ;;  %v537_v37 = vld [vmem:[%s5775_s1 + $0x930] sm:$0xff]  ;;  %v2552_v43 = vpack.c.bf16 %v695_v34, %v685_v33  ;;  %v2698_v33 = vpack.c.bf16 %v638_v27, %v628_v26 }
  0xa6   : > { %v637_v34 = vld [vmem:[%s5775_s1 + $0xc50] sm:$0xff] }
  0xa7   : > { %2533 = vmatpush1.bf16.msra.mxu1 %v2532_v44  ;;  %v2680_v44 = vpack.c.bf16 %v537_v37, %v527_v35  ;;  %v806_v35 = vld [vmem:[%s5775_s1 + $0x1198] sm:$0xff]  ;;  %v648_v37 = vld [vmem:[%s5775_s1 + $0xca8] sm:$0xff] }
  0xa8   : > { %2661 = vmatpush1.bf16.msra.mxu0 %v2660_v45  ;;  %2535 = vmatprep.subr.bf16.mxu1 %v2534_v46  ;;  %v2554_v45 = vpack.c.bf16 %v716_v39, %v706_v38  ;;  %v705_v46 = vld [vmem:[%s5775_s1 + $0xe70] sm:$0xff]  ;;  %v658_v38 = vld [vmem:[%s5775_s1 + $0xcf8] sm:$0xff] }
  0xa9   : > { %2663 = vmatprep.subr.bf16.mxu0 %v2662_v50  ;;  %v557_v50 = vld [vmem:[%s5775_s1 + $0x9d0] sm:$0xff]  ;;  %v2556_v55 = vpack.c.bf16 %v715_v47, %v705_v46  ;;  %v2702_v46 = vpack.c.bf16 %v658_v38, %v648_v37 }
  0xaa   : > { %v657_v47 = vld [vmem:[%s5775_s1 + $0xcf0] sm:$0xff] }
  0xab   : > { %2537 = vmatpush1.bf16.msra.mxu1 %v2536_v56  ;;  %v2684_v56 = vpack.c.bf16 %v557_v50, %v547_v48  ;;  %v826_v48 = vld [vmem:[%s5775_s1 + $0x1238] sm:$0xff]  ;;  %v668_v50 = vld [vmem:[%s5775_s1 + $0xd48] sm:$0xff] }
  0xac   : > { %2665 = vmatpush1.bf16.msra.mxu0 %v2664_v57  ;;  %2539 = vmatprep.subr.bf16.mxu1 %v2538_v58  ;;  %v2558_v57 = vpack.c.bf16 %v736_v52, %v726_v51  ;;  %v725_v58 = vld [vmem:[%s5775_s1 + $0xf10] sm:$0xff]  ;;  %v678_v51 = vld [vmem:[%s5775_s1 + $0xd98] sm:$0xff] }
  0xad   : > { %2667 = vmatprep.subr.bf16.mxu0 %v2666_v62  ;;  %v577_v62 = vld [vmem:[%s5775_s1 + $0xa70] sm:$0xff]  ;;  %v2560_v3 = vpack.c.bf16 %v735_v59, %v725_v58  ;;  %v2706_v58 = vpack.c.bf16 %v678_v51, %v668_v50 }
  0xae   : > { %v677_v59 = vld [vmem:[%s5775_s1 + $0xd90] sm:$0xff] }
  0xaf   : > { %2541 = vmatpush1.bf16.msra.mxu1 %v2540_v4  ;;  %v2688_v4 = vpack.c.bf16 %v577_v62, %v567_v60  ;;  %v846_v60 = vld [vmem:[%s5775_s1 + $0x12d8] sm:$0xff]  ;;  %v688_v62 = vld [vmem:[%s5775_s1 + $0xde8] sm:$0xff] }
  0xb0   : > { %2669 = vmatpush1.bf16.msra.mxu0 %v2668_v5  ;;  %2543 = vmatprep.subr.bf16.mxu1 %v2542_v6  ;;  %v2562_v5 = vpack.c.bf16 %v756_v0, %v746_v63  ;;  %v745_v6 = vld [vmem:[%s5775_s1 + $0xfb0] sm:$0xff]  ;;  %v698_v63 = vld [vmem:[%s5775_s1 + $0xe38] sm:$0xff] }
  0xb1   : > { %2671 = vmatprep.subr.bf16.mxu0 %v2670_v10  ;;  %v597_v10 = vld [vmem:[%s5775_s1 + $0xb10] sm:$0xff]  ;;  %v2564_v15 = vpack.c.bf16 %v755_v7, %v745_v6  ;;  %v2710_v6 = vpack.c.bf16 %v698_v63, %v688_v62 }
  0xb2   : > { %v697_v7 = vld [vmem:[%s5775_s1 + $0xe30] sm:$0xff] }
  0xb3   : > { %2545 = vmatpush1.bf16.msra.mxu1 %v2544_v18  ;;  %v2692_v18 = vpack.c.bf16 %v597_v10, %v587_v8  ;;  %v866_v8 = vld [vmem:[%s5775_s1 + $0x1378] sm:$0xff]  ;;  %v708_v10 = vld [vmem:[%s5775_s1 + $0xe88] sm:$0xff] }
  0xb4   : > { %2673 = vmatpush1.bf16.msra.mxu0 %v2672_v20  ;;  %2547 = vmatprep.subr.bf16.mxu1 %v2546_v21  ;;  %v2566_v20 = vpack.c.bf16 %v776_v12, %v766_v11  ;;  %v765_v21 = vld [vmem:[%s5775_s1 + $0x1050] sm:$0xff]  ;;  %v718_v11 = vld [vmem:[%s5775_s1 + $0xed8] sm:$0xff] }
  0xb5   : > { %2675 = vmatprep.subr.bf16.mxu0 %v2674_v16  ;;  %v786_v16 = vld [vmem:[%s5775_s1 + $0x10f8] sm:$0xff]  ;;  %v2568_v28 = vpack.c.bf16 %v775_v22, %v765_v21  ;;  %v2714_v21 = vpack.c.bf16 %v718_v11, %v708_v10  ;;  %v717_v22 = vld [vmem:[%s5775_s1 + $0xed0] sm:$0xff] }
  0xb7   : > { %2549 = vmatpush1.bf16.msra.mxu1 %v2548_v30  ;;  %v2570_v30 = vpack.c.bf16 %v796_v25, %v786_v16  ;;  %v738_v16 = vld [vmem:[%s5775_s1 + $0xf78] sm:$0xff] }
  0xb8   : > { %2677 = vmatpush1.bf16.msra.mxu0 %v2676_v31  ;;  %2551 = vmatprep.subr.bf16.mxu1 %v2550_v32  ;;  %v785_v31 = vld [vmem:[%s5775_s1 + $0x10f0] sm:$0xff]  ;;  %v627_v32 = vld [vmem:[%s5775_s1 + $0xc00] sm:$0xff] }
  0xb9   : > { %2679 = vmatprep.subr.bf16.mxu0 %v2678_v36  ;;  %v816_v36 = vld [vmem:[%s5775_s1 + $0x11e8] sm:$0xff]  ;;  %v2700_v40 = vpack.c.bf16 %v637_v34, %v627_v32  ;;  %v906_v32 = vld [vmem:[%s5775_s1 + $0x14b8] sm:$0xff] }
  0xba   : > { %v2574_v41 = vpack.c.bf16 %v816_v36, %v806_v35  ;;  %v748_v34 = vld [vmem:[%s5775_s1 + $0xfc8] sm:$0xff]  ;;  %v758_v35 = vld [vmem:[%s5775_s1 + $0x1018] sm:$0xff] }
  0xbb   : > { %2553 = vmatpush1.bf16.msra.mxu1 %v2552_v43  ;;  %v805_v43 = vld [vmem:[%s5775_s1 + $0x1190] sm:$0xff] }
  0xbc   : > { %2681 = vmatpush1.bf16.msra.mxu0 %v2680_v44  ;;  %2555 = vmatprep.subr.bf16.mxu1 %v2554_v45  ;;  %v815_v44 = vld [vmem:[%s5775_s1 + $0x11e0] sm:$0xff] }
  0xbd   : > { %2683 = vmatprep.subr.bf16.mxu0 %v2682_v49  ;;  %v647_v45 = vld [vmem:[%s5775_s1 + $0xca0] sm:$0xff]  ;;  %v836_v49 = vld [vmem:[%s5775_s1 + $0x1288] sm:$0xff]  ;;  %v2576_v52 = vpack.c.bf16 %v815_v44, %v805_v43  ;;  %v2722_v43 = vpack.c.bf16 %v758_v35, %v748_v34  ;;  %v757_v44 = vld [vmem:[%s5775_s1 + $0x1010] sm:$0xff] }
  0xbe   : > { %v2704_v53 = vpack.c.bf16 %v657_v47, %v647_v45  ;;  %v2578_v54 = vpack.c.bf16 %v836_v49, %v826_v48  ;;  %v926_v45 = vld [vmem:[%s5775_s1 + $0x1558] sm:$0xff]  ;;  %v4490_v47 = vld [vmem:[%s3536_s23 + $0x10] sm:$0xff]  ;;  %v768_v48 = vld [vmem:[%s5775_s1 + $0x1068] sm:$0xff] }
  0xbf   : > { %2557 = vmatpush1.bf16.msra.mxu1 %v2556_v55  ;;  %v825_v55 = vld [vmem:[%s5775_s1 + $0x1230] sm:$0xff]  ;;  %v778_v49 = vld [vmem:[%s5775_s1 + $0x10b8] sm:$0xff] }
  0xc0   : > { %2685 = vmatpush1.bf16.msra.mxu0 %v2684_v56  ;;  %2559 = vmatprep.subr.bf16.mxu1 %v2558_v57  ;;  %v835_v56 = vld [vmem:[%s5775_s1 + $0x1280] sm:$0xff] }
  0xc1   : > { %2687 = vmatprep.subr.bf16.mxu0 %v2686_v61  ;;  %v667_v57 = vld [vmem:[%s5775_s1 + $0xd40] sm:$0xff]  ;;  %v856_v61 = vld [vmem:[%s5775_s1 + $0x1328] sm:$0xff]  ;;  %v2580_v0 = vpack.c.bf16 %v835_v56, %v825_v55  ;;  %v2726_v56 = vpack.c.bf16 %v778_v49, %v768_v48 }
  0xc2   : > { %v2708_v1 = vpack.c.bf16 %v677_v59, %v667_v57  ;;  %v2582_v2 = vpack.c.bf16 %v856_v61, %v846_v60  ;;  %v767_v55 = vld [vmem:[%s5775_s1 + $0x1060] sm:$0xff]  ;;  %v777_v57 = vld [vmem:[%s5775_s1 + $0x10b0] sm:$0xff]  ;;  %v956_v59 = vld [vmem:[%s5775_s1 + $0x1648] sm:$0xff] }
  0xc3   : > { %2561 = vmatpush1.bf16.msra.mxu1 %v2560_v3  ;;  %1588 = vmatmul.mubr.f32.vlgmr.msra.gmra.mrb[2].mxu0 %v3691_v17  ;;  %v617_v17 = vld [vmem:[%s5775_s1 + $0xbb0] sm:$0xff]  ;;  %v788_v60 = vld [vmem:[%s5775_s1 + $0x1108] sm:$0xff]  ;;  %v798_v61 = vld [vmem:[%s5775_s1 + $0x1158] sm:$0xff]  ;;  %v2728_v63 = vpack.c.bf16 %v777_v57, %v767_v55 }
  0xc4   : > { %2689 = vmatpush1.bf16.msra.mxu0 %v2688_v4  ;;  %2563 = vmatprep.subr.bf16.mxu1 %v2562_v5  ;;  %v2696_v29 = vpack.c.bf16 %v617_v17, %v607_v23  ;;  %v845_v3 = vld [vmem:[%s5775_s1 + $0x12d0] sm:$0xff]  ;;  %v855_v4 = vld [vmem:[%s5775_s1 + $0x1320] sm:$0xff]  ;;  %v886_v23 = vld [vmem:[%s5775_s1 + $0x1418] sm:$0xff] }
  0xc5   : > { %2691 = vmatprep.subr.bf16.mxu0 %v2690_v9  ;;  %1658 = vmatprep.mubr.f32.mxu0 %v3567_v19  ;;  %v795_v19 = vld [vmem:[%s5775_s1 + $0x1140] sm:$0xff]  ;;  %v876_v9 = vld [vmem:[%s5775_s1 + $0x13c8] sm:$0xff]  ;;  %v2584_v12 = vpack.c.bf16 %v855_v4, %v845_v3  ;;  %v2730_v4 = vpack.c.bf16 %v798_v61, %v788_v60  ;;  %v877_v55 = vld [vmem:[%s5775_s1 + $0x13d0] sm:$0xff] }
  0xc6   : > { %v2572_v39 = vpack.c.bf16 %v795_v19, %v785_v31  ;;  %v687_v5 = vld [vmem:[%s5775_s1 + $0xde0] sm:$0xff]  ;;  %v2586_v14 = vpack.c.bf16 %v876_v9, %v866_v8  ;;  %v728_v17 = vld [vmem:[%s5775_s1 + $0xf28] sm:$0xff]  ;;  %v737_v19 = vld [vmem:[%s5775_s1 + $0xf70] sm:$0xff] }
  0xc7   : > { %2565 = vmatpush1.bf16.msra.mxu1 %v2564_v15  ;;  %v2712_v13 = vpack.c.bf16 %v697_v7, %v687_v5  ;;  %v865_v15 = vld [vmem:[%s5775_s1 + $0x1370] sm:$0xff]  ;;  %v2718_v31 = vpack.c.bf16 %v738_v16, %v728_v17  ;;  %v787_v3 = vld [vmem:[%s5775_s1 + $0x1100] sm:$0xff]  ;;  %v976_v7 = vld [vmem:[%s5775_s1 + $0x16e8] sm:$0xff] }
  0xc8   : > { %2693 = vmatpush1.bf16.msra.mxu0 %v2692_v18  ;;  %2567 = vmatprep.subr.bf16.mxu1 %v2566_v20  ;;  %v875_v18 = vld [vmem:[%s5775_s1 + $0x13c0] sm:$0xff]  ;;  %v797_v5 = vld [vmem:[%s5775_s1 + $0x1150] sm:$0xff]  ;;  %v808_v8 = vld [vmem:[%s5775_s1 + $0x11a8] sm:$0xff] }
  0xc9   : > { %2695 = vmatprep.subr.bf16.mxu0 %v2694_v24  ;;  %v707_v20 = vld [vmem:[%s5775_s1 + $0xe80] sm:$0xff]  ;;  %v896_v24 = vld [vmem:[%s5775_s1 + $0x1468] sm:$0xff]  ;;  %v2588_v25 = vpack.c.bf16 %v875_v18, %v865_v15  ;;  %v818_v9 = vld [vmem:[%s5775_s1 + $0x11f8] sm:$0xff]  ;;  %v2732_v11 = vpack.c.bf16 %v797_v5, %v787_v3 }
  0xca   : > { %v2716_v26 = vpack.c.bf16 %v717_v22, %v707_v20  ;;  %v2590_v27 = vpack.c.bf16 %v896_v24, %v886_v23  ;;  %v807_v15 = vld [vmem:[%s5775_s1 + $0x11a0] sm:$0xff]  ;;  %v2734_v18 = vpack.c.bf16 %v818_v9, %v808_v8  ;;  %v817_v20 = vld [vmem:[%s5775_s1 + $0x11f0] sm:$0xff]  ;;  %v996_v22 = vld [vmem:[%s5775_s1 + $0x1788] sm:$0xff] }
  0xcb   : > { %2569 = vmatpush1.bf16.msra.mxu1 %v2568_v28  ;;  %v885_v28 = vld [vmem:[%s5775_s1 + $0x1410] sm:$0xff]  ;;  %v828_v23 = vld [vmem:[%s5775_s1 + $0x1248] sm:$0xff]  ;;  %v838_v24 = vld [vmem:[%s5775_s1 + $0x1298] sm:$0xff]  ;;  %v2736_v16 = vpack.c.bf16 %v817_v20, %v807_v15 }
  0xcc   : > { %2697 = vmatpush1.bf16.msra.mxu0 %v2696_v29  ;;  %2571 = vmatprep.subr.bf16.mxu1 %v2570_v30  ;;  %v895_v29 = vld [vmem:[%s5775_s1 + $0x1460] sm:$0xff]  ;;  %v260_v57 = vld [vmem:[%s5775_s1 + $0x88] sm:$0xff]  ;;  %v897_v3 = vld [vmem:[%s5775_s1 + $0x1470] sm:$0xff] }
  0xcd   : > { %2699 = vmatprep.subr.bf16.mxu0 %v2698_v33  ;;  %v727_v30 = vld [vmem:[%s5775_s1 + $0xf20] sm:$0xff]  ;;  %v916_v33 = vld [vmem:[%s5775_s1 + $0x1508] sm:$0xff]  ;;  %v2592_v36 = vpack.c.bf16 %v895_v29, %v885_v28  ;;  %v2738_v29 = vpack.c.bf16 %v838_v24, %v828_v23  ;;  %v917_v15 = vld [vmem:[%s5775_s1 + $0x1510] sm:$0xff] }
  0xce   : > { %v2720_v37 = vpack.c.bf16 %v737_v19, %v727_v30  ;;  %v2594_v38 = vpack.c.bf16 %v916_v33, %v906_v32  ;;  %v827_v28 = vld [vmem:[%s5775_s1 + $0x1240] sm:$0xff]  ;;  %v837_v30 = vld [vmem:[%s5775_s1 + $0x1290] sm:$0xff]  ;;  %v1016_v19 = vld [vmem:[%s5775_s1 + $0x1828] sm:$0xff] }
  0xcf   : > { %2573 = vmatpush1.bf16.msra.mxu1 %v2572_v39  ;;  %v905_v39 = vld [vmem:[%s5775_s1 + $0x14b0] sm:$0xff]  ;;  %v848_v32 = vld [vmem:[%s5775_s1 + $0x12e8] sm:$0xff]  ;;  %v858_v33 = vld [vmem:[%s5775_s1 + $0x1338] sm:$0xff]  ;;  %v2740_v35 = vpack.c.bf16 %v837_v30, %v827_v28 }
  0xd0   : > { %2701 = vmatpush1.bf16.msra.mxu0 %v2700_v40  ;;  %2575 = vmatprep.subr.bf16.mxu1 %v2574_v41  ;;  %v915_v40 = vld [vmem:[%s5775_s1 + $0x1500] sm:$0xff]  ;;  %v280_v5 = vld [vmem:[%s5775_s1 + $0x128] sm:$0xff]  ;;  %v938_v23 = vld [vmem:[%s5775_s1 + $0x15b8] sm:$0xff] }
  0xd1   : > { %2703 = vmatprep.subr.bf16.mxu0 %v2702_v46  ;;  %v747_v41 = vld [vmem:[%s5775_s1 + $0xfc0] sm:$0xff]  ;;  %v936_v46 = vld [vmem:[%s5775_s1 + $0x15a8] sm:$0xff]  ;;  %v2596_v50 = vpack.c.bf16 %v915_v40, %v905_v39  ;;  %v2742_v40 = vpack.c.bf16 %v858_v33, %v848_v32  ;;  %v937_v28 = vld [vmem:[%s5775_s1 + $0x15b0] sm:$0xff] }
  0xd2   : > { %v2724_v51 = vpack.c.bf16 %v757_v44, %v747_v41  ;;  %v847_v39 = vld [vmem:[%s5775_s1 + $0x12e0] sm:$0xff]  ;;  %v857_v41 = vld [vmem:[%s5775_s1 + $0x1330] sm:$0xff]  ;;  %v1036_v44 = vld [vmem:[%s5775_s1 + $0x18c8] sm:$0xff] }
  0xd3   : > { %2577 = vmatpush1.bf16.msra.mxu1 %v2576_v52  ;;  %v2598_v52 = vpack.c.bf16 %v936_v46, %v926_v45  ;;  %v868_v45 = vld [vmem:[%s5775_s1 + $0x1388] sm:$0xff]  ;;  %v878_v46 = vld [vmem:[%s5775_s1 + $0x13d8] sm:$0xff]  ;;  %v2744_v49 = vpack.c.bf16 %v857_v41, %v847_v39 }
  0xd4   : > { %2705 = vmatpush1.bf16.msra.mxu0 %v2704_v53  ;;  %2579 = vmatprep.subr.bf16.mxu1 %v2578_v54  ;;  %v925_v53 = vld [vmem:[%s5775_s1 + $0x1550] sm:$0xff]  ;;  %v935_v54 = vld [vmem:[%s5775_s1 + $0x15a0] sm:$0xff]  ;;  %v300_v20 = vld [vmem:[%s5775_s1 + $0x1c8] sm:$0xff] }
  0xd5   : > { %2707 = vmatprep.subr.bf16.mxu0 %v2706_v58  ;;  %v946_v58 = vld [vmem:[%s5775_s1 + $0x15f8] sm:$0xff]  ;;  %v2600_v62 = vpack.c.bf16 %v935_v54, %v925_v53  ;;  %v867_v53 = vld [vmem:[%s5775_s1 + $0x1380] sm:$0xff]  ;;  %v2746_v54 = vpack.c.bf16 %v878_v46, %v868_v45  ;;  %v320_v30 = vld [vmem:[%s5775_s1 + $0x268] sm:$0xff] }
  0xd6   : > { %v2748_v61 = vpack.c.bf16 %v877_v55, %v867_v53  ;;  %v4723_v32 = vld [vmem:[%s3536_s23 + $0x8] sm:$0xff]  ;;  %v330_v41 = vld [vmem:[%s5775_s1 + $0x2b8] sm:$0xff] }
  0xd7   : > { %2581 = vmatpush1.bf16.msra.mxu1 %v2580_v0  ;;  %v2602_v0 = vpack.c.bf16 %v956_v59, %v946_v58  ;;  %v888_v58 = vld [vmem:[%s5775_s1 + $0x1428] sm:$0xff]  ;;  %v898_v59 = vld [vmem:[%s5775_s1 + $0x1478] sm:$0xff] }
  0xd8   : > { %2709 = vmatpush1.bf16.msra.mxu0 %v2708_v1  ;;  %2583 = vmatprep.subr.bf16.mxu1 %v2582_v2  ;;  %v945_v1 = vld [vmem:[%s5775_s1 + $0x15f0] sm:$0xff]  ;;  %v955_v2 = vld [vmem:[%s5775_s1 + $0x1640] sm:$0xff]  ;;  %v978_v45 = vld [vmem:[%s5775_s1 + $0x16f8] sm:$0xff] }
  0xd9   : > { %2711 = vmatprep.subr.bf16.mxu0 %v2710_v6  ;;  %v966_v6 = vld [vmem:[%s5775_s1 + $0x1698] sm:$0xff]  ;;  %v2604_v10 = vpack.c.bf16 %v955_v2, %v945_v1  ;;  %v259_v1 = vld [vmem:[%s5775_s1 + $0x80] sm:$0xff]  ;;  %v2750_v2 = vpack.c.bf16 %v898_v59, %v888_v58 }
  0xda   : > { %v350_v55 = vld [vmem:[%s5775_s1 + $0x358] sm:$0xff] }
  0xdb   : > { %2585 = vmatpush1.bf16.msra.mxu1 %v2584_v12  ;;  %v2606_v12 = vpack.c.bf16 %v976_v7, %v966_v6  ;;  %v908_v6 = vld [vmem:[%s5775_s1 + $0x14c8] sm:$0xff]  ;;  %v918_v7 = vld [vmem:[%s5775_s1 + $0x1518] sm:$0xff] }
  0xdc   : > { %2713 = vmatpush1.bf16.msra.mxu0 %v2712_v13  ;;  %2587 = vmatprep.subr.bf16.mxu1 %v2586_v14  ;;  %v965_v13 = vld [vmem:[%s5775_s1 + $0x1690] sm:$0xff]  ;;  %v975_v14 = vld [vmem:[%s5775_s1 + $0x16e0] sm:$0xff]  ;;  %v998_v58 = vld [vmem:[%s5775_s1 + $0x1798] sm:$0xff] }
  0xdd   : > { %2715 = vmatprep.subr.bf16.mxu0 %v2714_v21  ;;  %v986_v21 = vld [vmem:[%s5775_s1 + $0x1738] sm:$0xff]  ;;  %v2608_v17 = vpack.c.bf16 %v975_v14, %v965_v13  ;;  %v279_v13 = vld [vmem:[%s5775_s1 + $0x120] sm:$0xff]  ;;  %v2754_v14 = vpack.c.bf16 %v918_v7, %v908_v6 }
  0xde   : > { %v1018_v6 = vld [vmem:[%s5775_s1 + $0x1838] sm:$0xff] }
  0xdf   : > { %2589 = vmatpush1.bf16.msra.mxu1 %v2588_v25  ;;  %v2610_v25 = vpack.c.bf16 %v996_v22, %v986_v21  ;;  %v4687_v21 = vld [vmem:[%s3536_s23 + $0x20] sm:$0xff]  ;;  %v928_v22 = vld [vmem:[%s5775_s1 + $0x1568] sm:$0xff] }
  0xe0   : > { %2717 = vmatpush1.bf16.msra.mxu0 %v2716_v26  ;;  %2591 = vmatprep.subr.bf16.mxu1 %v2590_v27  ;;  %v985_v26 = vld [vmem:[%s5775_s1 + $0x1730] sm:$0xff]  ;;  %v995_v27 = vld [vmem:[%s5775_s1 + $0x1780] sm:$0xff] }
  0xe1   : > { %2719 = vmatprep.subr.bf16.mxu0 %v2718_v31  ;;  %v1006_v31 = vld [vmem:[%s5775_s1 + $0x17d8] sm:$0xff]  ;;  %v2612_v34 = vpack.c.bf16 %v995_v27, %v985_v26  ;;  %v289_v26 = vld [vmem:[%s5775_s1 + $0x170] sm:$0xff]  ;;  %v299_v27 = vld [vmem:[%s5775_s1 + $0x1c0] sm:$0xff] }
  0xe2   : > { %1446 = vmatmul.mubr.f32.vlgmr.msra.gmra.mrb[2].mxu1 %v4490_v47  ;;  %v2792_v33 = vpack.c.bf16 %v299_v27, %v289_v26  ;;  %v399_v26 = vld [vmem:[%s5775_s1 + $0x4e0] sm:$0xff] }
  0xe3   : > { %2593 = vmatpush1.bf16.msra.mxu1 %v2592_v36  ;;  %1516 = vmatprep.mubr.f32.mxu1 %v3188_v42  ;;  %v2614_v36 = vpack.c.bf16 %v1016_v19, %v1006_v31  ;;  %v948_v31 = vld [vmem:[%s5775_s1 + $0x1608] sm:$0xff]  ;;  %v958_v19 = vld [vmem:[%s5775_s1 + $0x1658] sm:$0xff] }
  0xe4   : > { %2721 = vmatpush1.bf16.msra.mxu0 %v2720_v37  ;;  %2595 = vmatprep.subr.bf16.mxu1 %v2594_v38  ;;  %v1005_v37 = vld [vmem:[%s5775_s1 + $0x17d0] sm:$0xff]  ;;  %v1015_v38 = vld [vmem:[%s5775_s1 + $0x1820] sm:$0xff]  ;;  %v2762_v39 = vpack.c.bf16 %v958_v19, %v948_v31  ;;  %v262_v31 = vld [vmem:[%s5775_s1 + $0x98] sm:$0xff] }
  0xe5   : > { %2723 = vmatprep.subr.bf16.mxu0 %v2722_v43  ;;  %v1026_v43 = vld [vmem:[%s5775_s1 + $0x1878] sm:$0xff]  ;;  %v2616_v48 = vpack.c.bf16 %v1015_v38, %v1005_v37  ;;  %v309_v37 = vld [vmem:[%s5775_s1 + $0x210] sm:$0xff]  ;;  %v319_v38 = vld [vmem:[%s5775_s1 + $0x260] sm:$0xff] }
  0xe6   : > { %v2796_v46 = vpack.c.bf16 %v319_v38, %v309_v37  ;;  %v251_v37 = vld [vmem:[%s5775_s1 + $0x40] sm:$0xff] }
  0xe7   : > { %2597 = vmatpush1.bf16.msra.mxu1 %v2596_v50  ;;  %v2618_v50 = vpack.c.bf16 %v1036_v44, %v1026_v43  ;;  %v340_v43 = vld [vmem:[%s5775_s1 + $0x308] sm:$0xff] }
  0xe8   : > { %2725 = vmatpush1.bf16.msra.mxu0 %v2724_v51  ;;  %2599 = vmatprep.subr.bf16.mxu1 %v2598_v52  ;;  %v1025_v51 = vld [vmem:[%s5775_s1 + $0x1870] sm:$0xff]  ;;  %v1035_v52 = vld [vmem:[%s5775_s1 + $0x18c0] sm:$0xff]  ;;  %v968_v44 = vld [vmem:[%s5775_s1 + $0x16a8] sm:$0xff] }
  0xe9   : > { %2727 = vmatprep.subr.bf16.mxu0 %v2726_v56  ;;  %v250_v56 = vld [vmem:[%s5775_s1 + $0x38] sm:$0xff]  ;;  %v2620_v60 = vpack.c.bf16 %v1035_v52, %v1025_v51  ;;  %v329_v51 = vld [vmem:[%s5775_s1 + $0x2b0] sm:$0xff]  ;;  %v339_v52 = vld [vmem:[%s5775_s1 + $0x300] sm:$0xff]  ;;  %v2766_v53 = vpack.c.bf16 %v978_v45, %v968_v44 }
  0xea   : > { %v2800_v59 = vpack.c.bf16 %v339_v52, %v329_v51  ;;  %v282_v44 = vld [vmem:[%s5775_s1 + $0x138] sm:$0xff]  ;;  %v271_v51 = vld [vmem:[%s5775_s1 + $0xe0] sm:$0xff] }
  0xeb   : > { %2601 = vmatpush1.bf16.msra.mxu1 %v2600_v62  ;;  %v2782_v62 = vpack.c.bf16 %v260_v57, %v250_v56  ;;  %v360_v56 = vld [vmem:[%s5775_s1 + $0x3a8] sm:$0xff] }
  0xec   : > { %2729 = vmatpush1.bf16.msra.mxu0 %v2728_v63  ;;  %2603 = vmatprep.subr.bf16.mxu1 %v2602_v0  ;;  %v887_v63 = vld [vmem:[%s5775_s1 + $0x1420] sm:$0xff]  ;;  %v249_v0 = vld [vmem:[%s5775_s1 + $0x30] sm:$0xff]  ;;  %v988_v57 = vld [vmem:[%s5775_s1 + $0x1748] sm:$0xff] }
  0xed   : > { %2731 = vmatprep.subr.bf16.mxu0 %v2730_v4  ;;  %v270_v4 = vld [vmem:[%s5775_s1 + $0xd8] sm:$0xff]  ;;  %v2784_v8 = vpack.c.bf16 %v259_v1, %v249_v0  ;;  %v2752_v9 = vpack.c.bf16 %v897_v3, %v887_v63  ;;  %v349_v63 = vld [vmem:[%s5775_s1 + $0x350] sm:$0xff]  ;;  %v359_v0 = vld [vmem:[%s5775_s1 + $0x3a0] sm:$0xff]  ;;  %v2770_v1 = vpack.c.bf16 %v998_v58, %v988_v57 }
  0xee   : > { %v370_v3 = vld [vmem:[%s5775_s1 + $0x3f8] sm:$0xff]  ;;  %v2804_v7 = vpack.c.bf16 %v359_v0, %v349_v63  ;;  %v291_v63 = vld [vmem:[%s5775_s1 + $0x180] sm:$0xff]  ;;  %v301_v0 = vld [vmem:[%s5775_s1 + $0x1d0] sm:$0xff] }
  0xef   : > { %2605 = vmatpush1.bf16.msra.mxu1 %v2604_v10  ;;  %v2786_v10 = vpack.c.bf16 %v280_v5, %v270_v4  ;;  %v380_v4 = vld [vmem:[%s5775_s1 + $0x448] sm:$0xff]  ;;  %v302_v57 = vld [vmem:[%s5775_s1 + $0x1d8] sm:$0xff] }
  0xf0   : > { %2733 = vmatpush1.bf16.msra.mxu0 %v2732_v11  ;;  %2607 = vmatprep.subr.bf16.mxu1 %v2606_v12  ;;  %v907_v11 = vld [vmem:[%s5775_s1 + $0x14c0] sm:$0xff]  ;;  %v269_v12 = vld [vmem:[%s5775_s1 + $0xd0] sm:$0xff]  ;;  %v1008_v5 = vld [vmem:[%s5775_s1 + $0x17e8] sm:$0xff] }
  0xf1   : > { %2735 = vmatprep.subr.bf16.mxu0 %v2734_v18  ;;  %v290_v18 = vld [vmem:[%s5775_s1 + $0x178] sm:$0xff]  ;;  %v2788_v24 = vpack.c.bf16 %v279_v13, %v269_v12  ;;  %v379_v12 = vld [vmem:[%s5775_s1 + $0x440] sm:$0xff]  ;;  %v2774_v13 = vpack.c.bf16 %v1018_v6, %v1008_v5  ;;  %v2952_v6 = vpack.c.bf16 %v301_v0, %v291_v63 }
  0xf2   : > { %v570_v0 = vld [vmem:[%s5775_s1 + $0xa38] sm:$0xff] }
  0xf3   : > { %2609 = vmatpush1.bf16.msra.mxu1 %v2608_v17  ;;  %v2756_v17 = vpack.c.bf16 %v917_v15, %v907_v11  ;;  %v369_v11 = vld [vmem:[%s5775_s1 + $0x3f0] sm:$0xff]  ;;  %v390_v15 = vld [vmem:[%s5775_s1 + $0x498] sm:$0xff] }
  0xf4   : > { %2737 = vmatpush1.bf16.msra.mxu0 %v2736_v16  ;;  %2611 = vmatprep.subr.bf16.mxu1 %v2610_v25  ;;  %v2790_v16 = vpack.c.bf16 %v300_v20, %v290_v18  ;;  %v927_v25 = vld [vmem:[%s5775_s1 + $0x1560] sm:$0xff]  ;;  %v400_v18 = vld [vmem:[%s5775_s1 + $0x4e8] sm:$0xff] }
  0xf5   : > { %2739 = vmatprep.subr.bf16.mxu0 %v2738_v29  ;;  %v310_v29 = vld [vmem:[%s5775_s1 + $0x218] sm:$0xff]  ;;  %v1028_v20 = vld [vmem:[%s5775_s1 + $0x1888] sm:$0xff] }
  0xf7   : > { %2613 = vmatpush1.bf16.msra.mxu1 %v2612_v34  ;;  %v2760_v34 = vpack.c.bf16 %v937_v28, %v927_v25  ;;  %v389_v25 = vld [vmem:[%s5775_s1 + $0x490] sm:$0xff]  ;;  %v410_v28 = vld [vmem:[%s5775_s1 + $0x538] sm:$0xff] }
  0xf8   : > { %2741 = vmatpush1.bf16.msra.mxu0 %v2740_v35  ;;  %2615 = vmatprep.subr.bf16.mxu1 %v2614_v36  ;;  %v2794_v35 = vpack.c.bf16 %v320_v30, %v310_v29  ;;  %v947_v36 = vld [vmem:[%s5775_s1 + $0x1600] sm:$0xff]  ;;  %v420_v29 = vld [vmem:[%s5775_s1 + $0x588] sm:$0xff]  ;;  %v2812_v19 = vpack.c.bf16 %v399_v26, %v389_v25  ;;  %v341_v25 = vld [vmem:[%s5775_s1 + $0x310] sm:$0xff] }
  0xf9   : > { %2743 = vmatprep.subr.bf16.mxu0 %v2742_v40  ;;  %v957_v40 = vld [vmem:[%s5775_s1 + $0x1650] sm:$0xff]  ;;  %v252_v30 = vld [vmem:[%s5775_s1 + $0x48] sm:$0xff]  ;;  %v510_v26 = vld [vmem:[%s5775_s1 + $0x858] sm:$0xff] }
  0xfa   : > { %v2942_v38 = vpack.c.bf16 %v262_v31, %v252_v30 }
  0xfb   : > { %2617 = vmatpush1.bf16.msra.mxu1 %v2616_v48  ;;  %v2764_v48 = vpack.c.bf16 %v957_v40, %v947_v36  ;;  %v419_v36 = vld [vmem:[%s5775_s1 + $0x580] sm:$0xff]  ;;  %v430_v40 = vld [vmem:[%s5775_s1 + $0x5d8] sm:$0xff] }
  0xfc   : > { %2745 = vmatpush1.bf16.msra.mxu0 %v2744_v49  ;;  %2619 = vmatprep.subr.bf16.mxu1 %v2618_v50  ;;  %v2798_v49 = vpack.c.bf16 %v340_v43, %v330_v41  ;;  %v967_v50 = vld [vmem:[%s5775_s1 + $0x16a0] sm:$0xff]  ;;  %v440_v41 = vld [vmem:[%s5775_s1 + $0x628] sm:$0xff] }
  0xfd   : > { %2747 = vmatprep.subr.bf16.mxu0 %v2746_v54  ;;  %v977_v54 = vld [vmem:[%s5775_s1 + $0x16f0] sm:$0xff]  ;;  %v272_v43 = vld [vmem:[%s5775_s1 + $0xe8] sm:$0xff] }
  0xfe   : > { %v2946_v52 = vpack.c.bf16 %v282_v44, %v272_v43 }
  0xff   : > { %2621 = vmatpush1.bf16.msra.mxu1 %v2620_v60  ;;  %v2768_v60 = vpack.c.bf16 %v977_v54, %v967_v50  ;;  %v439_v50 = vld [vmem:[%s5775_s1 + $0x620] sm:$0xff]  ;;  %v450_v54 = vld [vmem:[%s5775_s1 + $0x678] sm:$0xff] }
 0x100   : > { %2749 = vmatpush1.bf16.msra.mxu0 %v2748_v61  ;;  %2783 = vmatprep.subr.bf16.mxu1 %v2782_v62  ;;  %v2802_v61 = vpack.c.bf16 %v360_v56, %v350_v55  ;;  %v987_v62 = vld [vmem:[%s5775_s1 + $0x1740] sm:$0xff]  ;;  %v460_v55 = vld [vmem:[%s5775_s1 + $0x6c8] sm:$0xff] }
 0x101   : > { %2751 = vmatprep.subr.bf16.mxu0 %v2750_v2  ;;  %v997_v2 = vld [vmem:[%s5775_s1 + $0x1790] sm:$0xff]  ;;  %v292_v56 = vld [vmem:[%s5775_s1 + $0x188] sm:$0xff] }
 0x102   : > { %1517 = vmatmul.mubr.f32.vlgmr.msra.gmra.mrb[2].mxu1 %v4687_v21 }
 0x103   : > { %1659 = vmatmul.mubr.f32.vlgmr.msra.gmra.mrb[2].mxu0 %v4490_v47  ;;  %2785 = vmatpush1.bf16.msra.mxu1 %v2784_v8  ;;  %v2758_v47 = vpack.c.bf16 %v938_v23, %v928_v22  ;;  %v2772_v8 = vpack.c.bf16 %v997_v2, %v987_v62  ;;  %v1038_v22 = vld [vmem:[%s5775_s1 + $0x18d8] sm:$0xff]  ;;  %v2808_v23 = vpack.c.bf16 %v379_v12, %v369_v11  ;;  %v459_v62 = vld [vmem:[%s5775_s1 + $0x6c0] sm:$0xff]  ;;  %v480_v2 = vld [vmem:[%s5775_s1 + $0x768] sm:$0xff] }
 0x104   : > { %2753 = vmatpush1.bf16.msra.mxu0 %v2752_v9  ;;  %2787 = vmatprep.subr.bf16.mxu1 %v2786_v10  ;;  %v2806_v9 = vpack.c.bf16 %v380_v4, %v370_v3  ;;  %v1007_v10 = vld [vmem:[%s5775_s1 + $0x17e0] sm:$0xff]  ;;  %v2778_v27 = vpack.c.bf16 %v1038_v22, %v1028_v20  ;;  %v312_v3 = vld [vmem:[%s5775_s1 + $0x228] sm:$0xff]  ;;  %v322_v4 = vld [vmem:[%s5775_s1 + $0x278] sm:$0xff] }
 0x105   : > { %2755 = vmatprep.subr.bf16.mxu0 %v2754_v14  ;;  %1729 = vmatprep.mubr.f32.mxu0 %v3188_v42  ;;  %v1017_v14 = vld [vmem:[%s5775_s1 + $0x1830] sm:$0xff]  ;;  %v490_v12 = vld [vmem:[%s5775_s1 + $0x7b8] sm:$0xff] }
 0x106   : > { %1800 = vmatprep.mubr.f32.mxu1 %v4723_v32  ;;  %v321_v11 = vld [vmem:[%s5775_s1 + $0x270] sm:$0xff] }
 0x107   : > { %2789 = vmatpush1.bf16.msra.mxu1 %v2788_v24  ;;  %v2776_v24 = vpack.c.bf16 %v1017_v14, %v1007_v10  ;;  %v2954_v10 = vpack.c.bf16 %v322_v4, %v312_v3  ;;  %v332_v14 = vld [vmem:[%s5775_s1 + $0x2c8] sm:$0xff]  ;;  %v422_v3 = vld [vmem:[%s5775_s1 + $0x598] sm:$0xff] }
 0x108   : > { %2757 = vmatpush1.bf16.msra.mxu0 %v2756_v17  ;;  %2791 = vmatprep.subr.bf16.mxu1 %v2790_v16  ;;  %v2810_v17 = vpack.c.bf16 %v400_v18, %v390_v15  ;;  %v1027_v16 = vld [vmem:[%s5775_s1 + $0x1880] sm:$0xff]  ;;  %v342_v15 = vld [vmem:[%s5775_s1 + $0x318] sm:$0xff] }
 0x109   : > { %2759 = vmatprep.subr.bf16.mxu0 %v2758_v47  ;;  %v1037_v47 = vld [vmem:[%s5775_s1 + $0x18d0] sm:$0xff] }
 0x10b   : > { %2793 = vmatpush1.bf16.msra.mxu1 %v2792_v33  ;;  %v2780_v33 = vpack.c.bf16 %v1037_v47, %v1027_v16  ;;  %v2958_v16 = vpack.c.bf16 %v342_v15, %v332_v14  ;;  %v352_v47 = vld [vmem:[%s5775_s1 + $0x368] sm:$0xff]  ;;  %v442_v14 = vld [vmem:[%s5775_s1 + $0x638] sm:$0xff] }
 0x10c   : > { %2761 = vmatpush1.bf16.msra.mxu0 %v2760_v34  ;;  %2795 = vmatprep.subr.bf16.mxu1 %v2794_v35  ;;  %v2814_v34 = vpack.c.bf16 %v420_v29, %v410_v28  ;;  %v409_v35 = vld [vmem:[%s5775_s1 + $0x530] sm:$0xff]  ;;  %v362_v28 = vld [vmem:[%s5775_s1 + $0x3b8] sm:$0xff] }
 0x10d   : > { %2763 = vmatprep.subr.bf16.mxu0 %v2762_v39  ;;  %v261_v39 = vld [vmem:[%s5775_s1 + $0x90] sm:$0xff]  ;;  %v2816_v45 = vpack.c.bf16 %v419_v36, %v409_v35  ;;  %v2962_v35 = vpack.c.bf16 %v362_v28, %v352_v47  ;;  %v452_v47 = vld [vmem:[%s5775_s1 + $0x688] sm:$0xff]  ;;  %v462_v28 = vld [vmem:[%s5775_s1 + $0x6d8] sm:$0xff] }
 0x10e   : > { %v361_v36 = vld [vmem:[%s5775_s1 + $0x3b0] sm:$0xff] }
 0x10f   : > { %2797 = vmatpush1.bf16.msra.mxu1 %v2796_v46  ;;  %v2944_v46 = vpack.c.bf16 %v261_v39, %v251_v37  ;;  %v530_v37 = vld [vmem:[%s5775_s1 + $0x8f8] sm:$0xff]  ;;  %v372_v39 = vld [vmem:[%s5775_s1 + $0x408] sm:$0xff] }
 0x110   : > { %2765 = vmatpush1.bf16.msra.mxu0 %v2764_v48  ;;  %2799 = vmatprep.subr.bf16.mxu1 %v2798_v49  ;;  %v2818_v48 = vpack.c.bf16 %v440_v41, %v430_v40  ;;  %v429_v49 = vld [vmem:[%s5775_s1 + $0x5d0] sm:$0xff]  ;;  %v382_v40 = vld [vmem:[%s5775_s1 + $0x458] sm:$0xff] }
 0x111   : > { %2767 = vmatprep.subr.bf16.mxu0 %v2766_v53  ;;  %v281_v53 = vld [vmem:[%s5775_s1 + $0x130] sm:$0xff]  ;;  %v2820_v58 = vpack.c.bf16 %v439_v50, %v429_v49  ;;  %v2966_v49 = vpack.c.bf16 %v382_v40, %v372_v39  ;;  %v630_v39 = vld [vmem:[%s5775_s1 + $0xc18] sm:$0xff]  ;;  %v640_v40 = vld [vmem:[%s5775_s1 + $0xc68] sm:$0xff] }
 0x112   : > { %v381_v50 = vld [vmem:[%s5775_s1 + $0x450] sm:$0xff] }
 0x113   : > { %2801 = vmatpush1.bf16.msra.mxu1 %v2800_v59  ;;  %v2948_v59 = vpack.c.bf16 %v281_v53, %v271_v51  ;;  %v550_v51 = vld [vmem:[%s5775_s1 + $0x998] sm:$0xff] }
 0x114   : > { %2769 = vmatpush1.bf16.msra.mxu0 %v2768_v60  ;;  %2803 = vmatprep.subr.bf16.mxu1 %v2802_v61  ;;  %v2822_v60 = vpack.c.bf16 %v460_v55, %v450_v54  ;;  %v449_v61 = vld [vmem:[%s5775_s1 + $0x670] sm:$0xff]  ;;  %v392_v54 = vld [vmem:[%s5775_s1 + $0x4a8] sm:$0xff]  ;;  %v402_v55 = vld [vmem:[%s5775_s1 + $0x4f8] sm:$0xff] }
 0x115   : > { %2771 = vmatprep.subr.bf16.mxu0 %v2770_v1  ;;  %v470_v1 = vld [vmem:[%s5775_s1 + $0x718] sm:$0xff]  ;;  %v2824_v5 = vpack.c.bf16 %v459_v62, %v449_v61  ;;  %v559_v61 = vld [vmem:[%s5775_s1 + $0x9e0] sm:$0xff]  ;;  %v2970_v63 = vpack.c.bf16 %v402_v55, %v392_v54  ;;  %v481_v54 = vld [vmem:[%s5775_s1 + $0x770] sm:$0xff] }
 0x116   : > { %v391_v62 = vld [vmem:[%s5775_s1 + $0x4a0] sm:$0xff]  ;;  %v650_v55 = vld [vmem:[%s5775_s1 + $0xcb8] sm:$0xff] }
 0x117   : > { %2805 = vmatpush1.bf16.msra.mxu1 %v2804_v7  ;;  %v2826_v7 = vpack.c.bf16 %v480_v2, %v470_v1  ;;  %v580_v1 = vld [vmem:[%s5775_s1 + $0xa88] sm:$0xff] }
 0x118   : > { %2773 = vmatpush1.bf16.msra.mxu0 %v2772_v8  ;;  %2807 = vmatprep.subr.bf16.mxu1 %v2806_v9  ;;  %v469_v8 = vld [vmem:[%s5775_s1 + $0x710] sm:$0xff]  ;;  %v311_v9 = vld [vmem:[%s5775_s1 + $0x220] sm:$0xff]  ;;  %v412_v2 = vld [vmem:[%s5775_s1 + $0x548] sm:$0xff] }
 0x119   : > { %2775 = vmatprep.subr.bf16.mxu0 %v2774_v13  ;;  %v500_v13 = vld [vmem:[%s5775_s1 + $0x808] sm:$0xff]  ;;  %v2956_v20 = vpack.c.bf16 %v321_v11, %v311_v9  ;;  %v2974_v9 = vpack.c.bf16 %v422_v3, %v412_v2  ;;  %v590_v11 = vld [vmem:[%s5775_s1 + $0xad8] sm:$0xff]  ;;  %v491_v2 = vld [vmem:[%s5775_s1 + $0x7c0] sm:$0xff] }
 0x11a   : > { %v2830_v22 = vpack.c.bf16 %v500_v13, %v490_v12  ;;  %v600_v12 = vld [vmem:[%s5775_s1 + $0xb28] sm:$0xff] }
 0x11b   : > { %2809 = vmatpush1.bf16.msra.mxu1 %v2808_v23  ;;  %v489_v23 = vld [vmem:[%s5775_s1 + $0x7b0] sm:$0xff]  ;;  %v432_v13 = vld [vmem:[%s5775_s1 + $0x5e8] sm:$0xff] }
 0x11c   : > { %2777 = vmatpush1.bf16.msra.mxu0 %v2776_v24  ;;  %2811 = vmatprep.subr.bf16.mxu1 %v2810_v17  ;;  %v499_v24 = vld [vmem:[%s5775_s1 + $0x800] sm:$0xff] }
 0x11d   : > { %2779 = vmatprep.subr.bf16.mxu0 %v2778_v27  ;;  %v331_v17 = vld [vmem:[%s5775_s1 + $0x2c0] sm:$0xff]  ;;  %v520_v27 = vld [vmem:[%s5775_s1 + $0x8a8] sm:$0xff]  ;;  %v2832_v29 = vpack.c.bf16 %v499_v24, %v489_v23 }
 0x11e   : > { %v2960_v30 = vpack.c.bf16 %v341_v25, %v331_v17  ;;  %v2834_v31 = vpack.c.bf16 %v520_v27, %v510_v26  ;;  %v599_v23 = vld [vmem:[%s5775_s1 + $0xb20] sm:$0xff]  ;;  %v2978_v17 = vpack.c.bf16 %v442_v14, %v432_v13  ;;  %v610_v25 = vld [vmem:[%s5775_s1 + $0xb78] sm:$0xff]  ;;  %v620_v26 = vld [vmem:[%s5775_s1 + $0xbc8] sm:$0xff] }
 0x11f   : > { %2813 = vmatpush1.bf16.msra.mxu1 %v2812_v19  ;;  %v509_v19 = vld [vmem:[%s5775_s1 + $0x850] sm:$0xff]  ;;  %v431_v24 = vld [vmem:[%s5775_s1 + $0x5e0] sm:$0xff] }
 0x120   : > { %2781 = vmatpush1.bf16.msra.mxu0 %v2780_v33  ;;  %2815 = vmatprep.subr.bf16.mxu1 %v2814_v34  ;;  %v519_v33 = vld [vmem:[%s5775_s1 + $0x8a0] sm:$0xff]  ;;  %v669_v13 = vld [vmem:[%s5775_s1 + $0xd50] sm:$0xff] }
 0x121   : > { %2943 = vmatprep.subr.bf16.mxu0 %v2942_v38  ;;  %v351_v34 = vld [vmem:[%s5775_s1 + $0x360] sm:$0xff]  ;;  %v540_v38 = vld [vmem:[%s5775_s1 + $0x948] sm:$0xff]  ;;  %v2836_v41 = vpack.c.bf16 %v519_v33, %v509_v19  ;;  %v2854_v33 = vpack.c.bf16 %v620_v26, %v610_v25 }
 0x122   : > { %v2964_v43 = vpack.c.bf16 %v361_v36, %v351_v34  ;;  %v2838_v44 = vpack.c.bf16 %v540_v38, %v530_v37  ;;  %v5087_v27 = vld [vmem:[%s3536_s23] sm:$0xff]  ;;  %v609_v34 = vld [vmem:[%s5775_s1 + $0xb70] sm:$0xff]  ;;  %v2982_v37 = vpack.c.bf16 %v462_v28, %v452_v47 }
 0x123   : > { %1730 = vmatmul.mubr.f32.vlgmr.msra.gmra.mrb[2].mxu0 %v4687_v21  ;;  %2817 = vmatpush1.bf16.msra.mxu1 %v2816_v45  ;;  %v2950_v21 = vpack.c.bf16 %v302_v57, %v292_v56  ;;  %v529_v45 = vld [vmem:[%s5775_s1 + $0x8f0] sm:$0xff]  ;;  %v451_v36 = vld [vmem:[%s5775_s1 + $0x680] sm:$0xff] }
 0x124   : > { %2945 = vmatpush1.bf16.msra.mxu0 %v2944_v46  ;;  %2819 = vmatprep.subr.bf16.mxu1 %v2818_v48  ;;  %v539_v46 = vld [vmem:[%s5775_s1 + $0x940] sm:$0xff]  ;;  %v461_v38 = vld [vmem:[%s5775_s1 + $0x6d0] sm:$0xff] }
 0x125   : > { %2947 = vmatprep.subr.bf16.mxu0 %v2946_v52  ;;  %2013 = vmatprep.mubr.f32.mxu0 %v4723_v32  ;;  %v479_v32 = vld [vmem:[%s5775_s1 + $0x760] sm:$0xff]  ;;  %v560_v52 = vld [vmem:[%s5775_s1 + $0x9e8] sm:$0xff]  ;;  %v2840_v57 = vpack.c.bf16 %v539_v46, %v529_v45  ;;  %v2984_v46 = vpack.c.bf16 %v461_v38, %v451_v36 }
 0x126   : > { %v2828_v18 = vpack.c.bf16 %v479_v32, %v469_v8  ;;  %v371_v48 = vld [vmem:[%s5775_s1 + $0x400] sm:$0xff]  ;;  %v552_v38 = vld [vmem:[%s5775_s1 + $0x9a8] sm:$0xff] }
 0x127   : > { %2821 = vmatpush1.bf16.msra.mxu1 %v2820_v58  ;;  %v2968_v58 = vpack.c.bf16 %v381_v50, %v371_v48  ;;  %v579_v8 = vld [vmem:[%s5775_s1 + $0xa80] sm:$0xff]  ;;  %v2858_v48 = vpack.c.bf16 %v640_v40, %v630_v39  ;;  %v562_v39 = vld [vmem:[%s5775_s1 + $0x9f8] sm:$0xff] }
 0x128   : > { %2949 = vmatpush1.bf16.msra.mxu0 %v2948_v59  ;;  %2823 = vmatprep.subr.bf16.mxu1 %v2822_v60  ;;  %v2842_v59 = vpack.c.bf16 %v560_v52, %v550_v51  ;;  %v549_v60 = vld [vmem:[%s5775_s1 + $0x990] sm:$0xff]  ;;  %v411_v32 = vld [vmem:[%s5775_s1 + $0x540] sm:$0xff] }
 0x129   : > { %2951 = vmatprep.subr.bf16.mxu0 %v2950_v21  ;;  %v401_v21 = vld [vmem:[%s5775_s1 + $0x4f0] sm:$0xff]  ;;  %v2844_v4 = vpack.c.bf16 %v559_v61, %v549_v60  ;;  %v639_v50 = vld [vmem:[%s5775_s1 + $0xc60] sm:$0xff] }
 0x12a   : > { %v471_v51 = vld [vmem:[%s5775_s1 + $0x720] sm:$0xff] }
 0x12b   : > { %2825 = vmatpush1.bf16.msra.mxu1 %v2824_v5  ;;  %v2972_v5 = vpack.c.bf16 %v401_v21, %v391_v62  ;;  %v5153_v61 = vld [vmem:[%s5776_s2] sm:$0xff] }
 0x12c   : > { %2953 = vmatpush1.bf16.msra.mxu0 %v2952_v6  ;;  %2827 = vmatprep.subr.bf16.mxu1 %v2826_v7  ;;  %v2846_v6 = vpack.c.bf16 %v580_v1, %v570_v0  ;;  %v569_v7 = vld [vmem:[%s5775_s1 + $0xa30] sm:$0xff]  ;;  %v659_v1 = vld [vmem:[%s5775_s1 + $0xd00] sm:$0xff] }
 0x12d   : > { %2955 = vmatprep.subr.bf16.mxu0 %v2954_v10  ;;  %v421_v10 = vld [vmem:[%s5775_s1 + $0x590] sm:$0xff]  ;;  %v2848_v15 = vpack.c.bf16 %v579_v8, %v569_v7  ;;  %v512_v8 = vld [vmem:[%s5775_s1 + $0x868] sm:$0xff]  ;;  %v679_v14 = vld [vmem:[%s5775_s1 + $0xda0] sm:$0xff] }
 0x12e   : > { %v649_v0 = vld [vmem:[%s5775_s1 + $0xcb0] sm:$0xff]  ;;  %v2868_v26 = vpack.c.bf16 %v679_v14, %v669_v13  ;;  %v592_v13 = vld [vmem:[%s5775_s1 + $0xae8] sm:$0xff]  ;;  %v602_v14 = vld [vmem:[%s5775_s1 + $0xb38] sm:$0xff] }
 0x12f   : > { %2829 = vmatpush1.bf16.msra.mxu1 %v2828_v18  ;;  %v2976_v18 = vpack.c.bf16 %v421_v10, %v411_v32  ;;  %v522_v32 = vld [vmem:[%s5775_s1 + $0x8b8] sm:$0xff]  ;;  %v2864_v10 = vpack.c.bf16 %v659_v1, %v649_v0 }
 0x130   : > { %2957 = vmatpush1.bf16.msra.mxu0 %v2956_v20  ;;  %2831 = vmatprep.subr.bf16.mxu1 %v2830_v22  ;;  %v2850_v20 = vpack.c.bf16 %v600_v12, %v590_v11  ;;  %v589_v22 = vld [vmem:[%s5775_s1 + $0xad0] sm:$0xff] }
 0x131   : > { %2959 = vmatprep.subr.bf16.mxu0 %v2958_v16  ;;  %v441_v16 = vld [vmem:[%s5775_s1 + $0x630] sm:$0xff] }
 0x132   : > { %v2980_v19 = vpack.c.bf16 %v441_v16, %v431_v24  ;;  %v542_v16 = vld [vmem:[%s5775_s1 + $0x958] sm:$0xff] }
 0x133   : > { %2833 = vmatpush1.bf16.msra.mxu1 %v2832_v29  ;;  %v2852_v29 = vpack.c.bf16 %v599_v23, %v589_v22  ;;  %v690_v22 = vld [vmem:[%s5775_s1 + $0xdf8] sm:$0xff]  ;;  %v700_v23 = vld [vmem:[%s5775_s1 + $0xe48] sm:$0xff] }
 0x134   : > { %2961 = vmatpush1.bf16.msra.mxu0 %v2960_v30  ;;  %2835 = vmatprep.subr.bf16.mxu1 %v2834_v31  ;;  %v1047_v30 = vlaneseq  ;;  %v5097_v31 = vld [vmem:[%s3536_s23 + $0x18] sm:$0xff]  ;;  %v2870_v28 = vpack.c.bf16 %v700_v23, %v690_v22  ;;  %v749_v22 = vld [vmem:[%s5775_s1 + $0xfd0] sm:$0xff]  ;;  %v759_v23 = vld [vmem:[%s5775_s1 + $0x1020] sm:$0xff] }
 0x135   : > { %2963 = vmatprep.subr.bf16.mxu0 %v2962_v35  ;;  %v5010_v53 = vpop.f32.mrb[0].mxu1  ;;  %v619_v35 = vld [vmem:[%s5775_s1 + $0xbc0] sm:$0xff] }
 0x136   : > { %v5018_v56 = vpop.f32.mrb[1].mxu1  ;;  %v5124_v45 = vshrl.u32 %v1047_v30, 7  ;;  %v699_v30 = vld [vmem:[%s5775_s1 + $0xe40] sm:$0xff] }
 0x137   : > { %2837 = vmatpush1.bf16.msra.mxu1 %v2836_v41  ;;  %v472_v41 = vld [vmem:[%s5775_s1 + $0x728] sm:$0xff] }
 0x138   : > { %2965 = vmatpush1.bf16.msra.mxu0 %v2964_v43  ;;  %2839 = vmatprep.subr.bf16.mxu1 %v2838_v44  ;;  %v482_v43 = vld [vmem:[%s5775_s1 + $0x778] sm:$0xff]  ;;  %v2856_v44 = vpack.c.bf16 %v619_v35, %v609_v34  ;;  %v1049_v62 = vsub.s32 0, %v5124_v45  ;;  %v1053_v7 = vsub.s32 1, %v5124_v45  ;;  %v720_v35 = vld [vmem:[%s5775_s1 + $0xee8] sm:$0xff] }
 0x139   : > { %2967 = vmatprep.subr.bf16.mxu0 %v2966_v49  ;;  %v629_v49 = vld [vmem:[%s5775_s1 + $0xc10] sm:$0xff]  ;;  %v2986_v52 = vpack.c.bf16 %v482_v43, %v472_v41  ;;  %v710_v34 = vld [vmem:[%s5775_s1 + $0xe98] sm:$0xff] }
 0x13a   : > { %v2860_v60 = vpack.c.bf16 %v639_v50, %v629_v49  ;;  %v1054_v24 = vrot.slane %v5153_v61, %v1053_v7  ;;  %v709_v49 = vld [vmem:[%s5775_s1 + $0xe90] sm:$0xff]  ;;  %v719_v50 = vld [vmem:[%s5775_s1 + $0xee0] sm:$0xff] }
 0x13b   : > { %2841 = vmatpush1.bf16.msra.mxu1 %v2840_v57  ;;  %v660_v57 = vld [vmem:[%s5775_s1 + $0xd08] sm:$0xff]  ;;  %v2876_v1 = vpack.c.bf16 %v719_v50, %v709_v49  ;;  %v810_v49 = vld [vmem:[%s5775_s1 + $0x11b8] sm:$0xff] }
 0x13c   : > { %2969 = vmatpush1.bf16.msra.mxu0 %v2968_v58  ;;  %2843 = vmatprep.subr.bf16.mxu1 %v2842_v59  ;;  %v492_v58 = vld [vmem:[%s5775_s1 + $0x7c8] sm:$0xff]  ;;  %v502_v59 = vld [vmem:[%s5775_s1 + $0x818] sm:$0xff]  ;;  %v2862_v21 = vpack.c.bf16 %v660_v57, %v650_v55  ;;  %v1166_v36 = vadd.f32 %v5018_v56, %v1054_v24  ;;  %v2874_v56 = vpack.c.bf16 %v720_v35, %v710_v34  ;;  %v561_v57 = vld [vmem:[%s5775_s1 + $0x9f0] sm:$0xff] }
 0x13d   : > { %2971 = vmatprep.subr.bf16.mxu0 %v2970_v63  ;;  %v2988_v63 = vpack.c.bf16 %v481_v54, %v471_v51  ;;  %v2990_v3 = vpack.c.bf16 %v502_v59, %v492_v58  ;;  %v551_v51 = vld [vmem:[%s5775_s1 + $0x9a0] sm:$0xff]  ;;  %v2176_v54 = vstv %s5195_s30  ;;  %v3002_v55 = vpack.c.bf16 %v562_v39, %v552_v38  ;;  %v730_v58 = vld [vmem:[%s5775_s1 + $0xf38] sm:$0xff]  ;;  %v740_v59 = vld [vmem:[%s5775_s1 + $0xf88] sm:$0xff]  ;;  %s2290_s30 = sshll.u32 %s5782_s21, 3 }
 0x13e   : > { %v591_v24 = vld [vmem:[%s5775_s1 + $0xae0] sm:$0xff]  ;;  %v632_v38 = vld [vmem:[%s5775_s1 + $0xc28] sm:$0xff]  ;;  %v642_v39 = vld [vmem:[%s5775_s1 + $0xc78] sm:$0xff]  ;;  %s237_s27 = scalar_lea.vmem %s5779_s5, %s2290_s30 }
 0x13f   : > { %2845 = vmatpush1.bf16.msra.mxu1 %v2844_v4  ;;  %v501_v4 = vld [vmem:[%s5775_s1 + $0x810] sm:$0xff]  ;;  %v611_v34 = vld [vmem:[%s5775_s1 + $0xb80] sm:$0xff]  ;;  %v820_v50 = vld [vmem:[%s5775_s1 + $0x1208] sm:$0xff] }
 0x140   : > { %2973 = vmatpush1.bf16.msra.mxu0 %v2972_v5  ;;  %2847 = vmatprep.subr.bf16.mxu1 %v2846_v6  ;;  %v670_v5 = vld [vmem:[%s5775_s1 + $0xd58] sm:$0xff]  ;;  %v680_v6 = vld [vmem:[%s5775_s1 + $0xda8] sm:$0xff]  ;;  %v2992_v11 = vpack.c.bf16 %v501_v4, %v491_v2  ;;  %v2878_v4 = vpack.c.bf16 %v740_v59, %v730_v58  ;;  %v809_v58 = vld [vmem:[%s5775_s1 + $0x11b0] sm:$0xff] }
 0x141   : > { %2975 = vmatprep.subr.bf16.mxu0 %v2974_v9  ;;  %v1050_v9 = vrot.slane %v5153_v61, %v1049_v62  ;;  %v2866_v12 = vpack.c.bf16 %v680_v6, %v670_v5  ;;  %v729_v5 = vld [vmem:[%s5775_s1 + $0xf30] sm:$0xff]  ;;  %v739_v6 = vld [vmem:[%s5775_s1 + $0xf80] sm:$0xff] }
 0x142   : > { %1801 = vmatmul.mubr.f32.vlgmr.msra.gmra.mrb[4].mxu1 %v5087_v27  ;;  %v819_v59 = vld [vmem:[%s5775_s1 + $0x1200] sm:$0xff] }
 0x143   : > { %2849 = vmatpush1.bf16.msra.mxu1 %v2848_v15  ;;  %1871 = vmatprep.mubr.f32.mxu1 %v5097_v31  ;;  %v511_v15 = vld [vmem:[%s5775_s1 + $0x860] sm:$0xff]  ;;  %v1164_v25 = vadd.f32 %v5010_v53, %v1050_v9  ;;  %v581_v9 = vld [vmem:[%s5775_s1 + $0xa90] sm:$0xff] }
 0x144   : > { %2977 = vmatpush1.bf16.msra.mxu0 %v2976_v18  ;;  %2851 = vmatprep.subr.bf16.mxu1 %v2850_v20  ;;  %v2994_v18 = vpack.c.bf16 %v522_v32, %v512_v8  ;;  %v521_v20 = vld [vmem:[%s5775_s1 + $0x8b0] sm:$0xff]  ;;  %v571_v8 = vld [vmem:[%s5775_s1 + $0xa40] sm:$0xff] }
 0x145   : > { %2979 = vmatprep.subr.bf16.mxu0 %v2978_v17  ;;  %v532_v17 = vld [vmem:[%s5775_s1 + $0x908] sm:$0xff]  ;;  %v2996_v47 = vpack.c.bf16 %v521_v20, %v511_v15  ;;  %v2880_v15 = vpack.c.bf16 %v739_v6, %v729_v5 }
 0x146   : > { %v2998_v53 = vpack.c.bf16 %v542_v16, %v532_v17  ;;  %v3010_v17 = vpack.c.bf16 %v602_v14, %v592_v13  ;;  %v601_v16 = vld [vmem:[%s5775_s1 + $0xb30] sm:$0xff]  ;;  %v850_v13 = vld [vmem:[%s5775_s1 + $0x12f8] sm:$0xff]  ;;  %v860_v14 = vld [vmem:[%s5775_s1 + $0x1348] sm:$0xff] }
 0x147   : > { %2853 = vmatpush1.bf16.msra.mxu1 %v2852_v29  ;;  %v689_v29 = vld [vmem:[%s5775_s1 + $0xdf0] sm:$0xff] }
 0x148   : > { %2981 = vmatpush1.bf16.msra.mxu0 %v2980_v19  ;;  %2855 = vmatprep.subr.bf16.mxu1 %v2854_v33  ;;  %v531_v19 = vld [vmem:[%s5775_s1 + $0x900] sm:$0xff]  ;;  %v541_v33 = vld [vmem:[%s5775_s1 + $0x950] sm:$0xff]  ;;  %v2872_v43 = vpack.c.bf16 %v699_v30, %v689_v29  ;;  %v2884_v29 = vpack.c.bf16 %v759_v23, %v749_v22  ;;  %v3012_v30 = vpack.c.bf16 %v601_v16, %v591_v24 }
 0x149   : > { %2983 = vmatprep.subr.bf16.mxu0 %v2982_v37  ;;  %v2902_v23 = vpack.c.bf16 %v860_v14, %v850_v13  ;;  %v849_v24 = vld [vmem:[%s5775_s1 + $0x12f0] sm:$0xff]  ;;  %v691_v16 = vld [vmem:[%s5775_s1 + $0xe00] sm:$0xff] }
 0x14a   : > { %v771_v13 = vld [vmem:[%s5775_s1 + $0x1080] sm:$0xff] }
 0x14b   : > { %2857 = vmatpush1.bf16.msra.mxu1 %v2856_v44  ;;  %v2173_v44 = vstv %s5184_s4  ;;  %s2294_s4 = sld [smem:[#allocation3 + $0x4]] }
 0x14c   : > { %2985 = vmatpush1.bf16.msra.mxu0 %v2984_v46  ;;  %2859 = vmatprep.subr.bf16.mxu1 %v2858_v48  ;;  %v3000_v48 = vpack.c.bf16 %v541_v33, %v531_v19  ;;  %v779_v33 = vld [vmem:[%s5775_s1 + $0x10c0] sm:$0xff] }
 0x14d   : > { %2987 = vmatprep.subr.bf16.mxu0 %v2986_v52 }
 0x14f   : > { %2861 = vmatpush1.bf16.msra.mxu1 %v2860_v60 }
 0x150   : > { %2989 = vmatpush1.bf16.msra.mxu0 %v2988_v63  ;;  %2863 = vmatprep.subr.bf16.mxu1 %v2862_v21  ;;  %v572_v63 = vld [vmem:[%s5775_s1 + $0xa48] sm:$0xff]  ;;  %v582_v21 = vld [vmem:[%s5775_s1 + $0xa98] sm:$0xff] }
 0x151   : > { %2991 = vmatprep.subr.bf16.mxu0 %v2990_v3  ;;  %v3004_v3 = vpack.c.bf16 %v561_v57, %v551_v51  ;;  %v3006_v32 = vpack.c.bf16 %v582_v21, %v572_v63  ;;  %v652_v51 = vld [vmem:[%s5775_s1 + $0xcc8] sm:$0xff]  ;;  %v2894_v57 = vpack.c.bf16 %v820_v50, %v810_v49  ;;  %v661_v21 = vld [vmem:[%s5775_s1 + $0xd10] sm:$0xff] }
 0x152   : > { %v741_v50 = vld [vmem:[%s5775_s1 + $0xf90] sm:$0xff] }
 0x153   : > { %2865 = vmatpush1.bf16.msra.mxu1 %v2864_v10  ;;  %v750_v10 = vld [vmem:[%s5775_s1 + $0xfd8] sm:$0xff] }
 0x154   : > { %2993 = vmatpush1.bf16.msra.mxu0 %v2992_v11  ;;  %2867 = vmatprep.subr.bf16.mxu1 %v2866_v12  ;;  %v760_v11 = vld [vmem:[%s5775_s1 + $0x1028] sm:$0xff] }
 0x155   : > { %2995 = vmatprep.subr.bf16.mxu0 %v2994_v18  ;;  %v3008_v18 = vpack.c.bf16 %v581_v9, %v571_v8  ;;  %v2882_v20 = vpack.c.bf16 %v760_v11, %v750_v10  ;;  %v829_v8 = vld [vmem:[%s5775_s1 + $0x1250] sm:$0xff]  ;;  %v671_v9 = vld [vmem:[%s5775_s1 + $0xd60] sm:$0xff] }
 0x156   : > { %v1305_v37 = vpop.f32.mrb[0].mxu0  ;;  %v681_v11 = vld [vmem:[%s5775_s1 + $0xdb0] sm:$0xff] }
 0x157   : > { %v3103_v40 = vadd.f32 %v1305_v37, %v1164_v25  ;;  %v1307_v41 = vpop.f32.mrb[1].mxu0  ;;  %2869 = vmatpush1.bf16.msra.mxu1 %v2868_v26  ;;  %v770_v25 = vld [vmem:[%s5775_s1 + $0x1078] sm:$0xff]  ;;  %v780_v26 = vld [vmem:[%s5775_s1 + $0x10c8] sm:$0xff]  ;;  %v3028_v22 = vpack.c.bf16 %v681_v11, %v671_v9  ;;  %v939_v11 = vld [vmem:[%s5775_s1 + $0x15c0] sm:$0xff] }
 0x158   : > { %v3105_v46 = vadd.f32 %v1307_v41, %v1166_v36  ;;  %2997 = vmatpush1.bf16.msra.mxu0 %v2996_v47  ;;  %2871 = vmatprep.subr.bf16.mxu1 %v2870_v28  ;;  %v612_v47 = vld [vmem:[%s5775_s1 + $0xb88] sm:$0xff]  ;;  %v622_v28 = vld [vmem:[%s5775_s1 + $0xbd8] sm:$0xff]  ;;  %v2886_v19 = vpack.c.bf16 %v780_v26, %v770_v25  ;;  %v701_v26 = vld [vmem:[%s5775_s1 + $0xe50] sm:$0xff] }
 0x159   : > { %v2162_v52 = vmax.f32 %v3103_v40, 0.0  ;;  %2999 = vmatprep.subr.bf16.mxu0 %v2998_v53  ;;  %v769_v53 = vld [vmem:[%s5775_s1 + $0x1070] sm:$0xff]  ;;  %v3014_v35 = vpack.c.bf16 %v622_v28, %v612_v47  ;;  %v790_v36 = vld [vmem:[%s5775_s1 + $0x1118] sm:$0xff]  ;;  %v800_v37 = vld [vmem:[%s5775_s1 + $0x1168] sm:$0xff] }
 0x15a   : > { %v2163_v60 = vmax.f32 %v3105_v46, 0.0  ;;  %v2888_v40 = vpack.c.bf16 %v779_v33, %v769_v53  ;;  %v631_v46 = vld [vmem:[%s5775_s1 + $0xc20] sm:$0xff]  ;;  %v870_v47 = vld [vmem:[%s5775_s1 + $0x1398] sm:$0xff]  ;;  %v880_v28 = vld [vmem:[%s5775_s1 + $0x13e8] sm:$0xff]  ;;  %v3032_v53 = vpack.c.bf16 %v701_v26, %v691_v16 }
 0x15b   : > { %v2174_v0 = vmul.f32 %v2173_v44, %v2162_v52  ;;  %2873 = vmatpush1.bf16.msra.mxu1 %v2872_v43  ;;  %v2890_v43 = vpack.c.bf16 %v800_v37, %v790_v36  ;;  %v789_v44 = vld [vmem:[%s5775_s1 + $0x1110] sm:$0xff]  ;;  %v662_v52 = vld [vmem:[%s5775_s1 + $0xd18] sm:$0xff]  ;;  %v2906_v33 = vpack.c.bf16 %v880_v28, %v870_v47  ;;  %v959_v26 = vld [vmem:[%s5775_s1 + $0x1660] sm:$0xff] }
 0x15c   : > { %v2177_v2 = vmul.f32 %v2176_v54, %v2163_v60  ;;  %3001 = vmatpush1.bf16.msra.mxu0 %v3000_v48  ;;  %2875 = vmatprep.subr.bf16.mxu1 %v2874_v56  ;;  %v3018_v48 = vpack.c.bf16 %v642_v39, %v632_v38  ;;  %v641_v56 = vld [vmem:[%s5775_s1 + $0xc70] sm:$0xff]  ;;  %v651_v60 = vld [vmem:[%s5775_s1 + $0xcc0] sm:$0xff]  ;;  %v3022_v63 = vpack.c.bf16 %v662_v52, %v652_v51  ;;  %v890_v38 = vld [vmem:[%s5775_s1 + $0x1438] sm:$0xff] }
 0x15d   : > { %3003 = vmatprep.subr.bf16.mxu0 %v3002_v55  ;;  %v3020_v55 = vpack.c.bf16 %v641_v56, %v631_v46  ;;  %v3024_v5 = vpack.c.bf16 %v661_v21, %v651_v60  ;;  %v721_v37 = vld [vmem:[%s5775_s1 + $0xef0] sm:$0xff]  ;;  %v900_v39 = vld [vmem:[%s5775_s1 + $0x1488] sm:$0xff]  ;;  %v731_v56 = vld [vmem:[%s5775_s1 + $0xf40] sm:$0xff] }
 0x15e   : > { %v5285_v12 = vadd.f32 %v2177_v2, %v2174_v0  ;;  %v830_v0 = vld [vmem:[%s5775_s1 + $0x1258] sm:$0xff]  ;;  %v672_v2 = vld [vmem:[%s5775_s1 + $0xd68] sm:$0xff]  ;;  %v889_v46 = vld [vmem:[%s5775_s1 + $0x1430] sm:$0xff] }
 0x15f   : > { %2877 = vmatpush1.bf16.msra.mxu1 %v2876_v1  ;;  %v840_v1 = vld [vmem:[%s5775_s1 + $0x12a8] sm:$0xff]  ;;  %v910_v51 = vld [vmem:[%s5775_s1 + $0x14d8] sm:$0xff]  ;;  %v909_v60 = vld [vmem:[%s5775_s1 + $0x14d0] sm:$0xff] }
 0x160   : > { %3005 = vmatpush1.bf16.msra.mxu0 %v3004_v3  ;;  %2879 = vmatprep.subr.bf16.mxu1 %v2878_v4  ;;  %v682_v3 = vld [vmem:[%s5775_s1 + $0xdb8] sm:$0xff]  ;;  %v2896_v4 = vpack.c.bf16 %v819_v59, %v809_v58  ;;  %v2898_v6 = vpack.c.bf16 %v840_v1, %v830_v0  ;;  %v920_v52 = vld [vmem:[%s5775_s1 + $0x1528] sm:$0xff]  ;;  %v3040_v58 = vpack.c.bf16 %v741_v50, %v731_v56  ;;  %v751_v21 = vld [vmem:[%s5775_s1 + $0xfe0] sm:$0xff] }
 0x161   : > { %3007 = vmatprep.subr.bf16.mxu0 %v3006_v32  ;;  %v839_v32 = vld [vmem:[%s5775_s1 + $0x12a0] sm:$0xff]  ;;  %v3026_v10 = vpack.c.bf16 %v682_v3, %v672_v2  ;;  %v2914_v59 = vpack.c.bf16 %v920_v52, %v910_v51  ;;  %v761_v1 = vld [vmem:[%s5775_s1 + $0x1030] sm:$0xff]  ;;  %v930_v2 = vld [vmem:[%s5775_s1 + $0x1578] sm:$0xff] }
 0x162   : > { %v940_v3 = vld [vmem:[%s5775_s1 + $0x15c8] sm:$0xff]  ;;  %v791_v47 = vld [vmem:[%s5775_s1 + $0x1120] sm:$0xff] }
 0x163   : > { %2881 = vmatpush1.bf16.msra.mxu1 %v2880_v15  ;;  %2014 = vmatmul.mubr.f32.vlgmr.msra.gmra.mrb[4].mxu0 %v5087_v27  ;;  %v621_v27 = vld [vmem:[%s5775_s1 + $0xbd0] sm:$0xff]  ;;  %v692_v15 = vld [vmem:[%s5775_s1 + $0xe08] sm:$0xff]  ;;  %v2918_v9 = vpack.c.bf16 %v940_v3, %v930_v2  ;;  %v999_v50 = vld [vmem:[%s5775_s1 + $0x17a0] sm:$0xff] }
 0x164   : > { %3009 = vmatpush1.bf16.msra.mxu0 %v3008_v18  ;;  %2883 = vmatprep.subr.bf16.mxu1 %v2882_v20  ;;  %v3016_v41 = vpack.c.bf16 %v621_v27, %v611_v34  ;;  %v702_v18 = vld [vmem:[%s5775_s1 + $0xe58] sm:$0xff]  ;;  %v2900_v20 = vpack.c.bf16 %v839_v32, %v829_v8  ;;  %v869_v34 = vld [vmem:[%s5775_s1 + $0x1390] sm:$0xff]  ;;  %v711_v27 = vld [vmem:[%s5775_s1 + $0xea0] sm:$0xff]  ;;  %v3044_v32 = vpack.c.bf16 %v761_v1, %v751_v21 }
 0x165   : > { %3011 = vmatprep.subr.bf16.mxu0 %v3010_v17  ;;  %2084 = vmatprep.mubr.f32.mxu0 %v5097_v31  ;;  %v799_v31 = vld [vmem:[%s5775_s1 + $0x1160] sm:$0xff]  ;;  %v3030_v25 = vpack.c.bf16 %v702_v18, %v692_v15  ;;  %v781_v15 = vld [vmem:[%s5775_s1 + $0x10d0] sm:$0xff]  ;;  %v950_v18 = vld [vmem:[%s5775_s1 + $0x1618] sm:$0xff] }
 0x166   : > { %v2892_v54 = vpack.c.bf16 %v799_v31, %v789_v44  ;;  %v859_v17 = vld [vmem:[%s5775_s1 + $0x1340] sm:$0xff]  ;;  %v3036_v44 = vpack.c.bf16 %v721_v37, %v711_v27  ;;  %v2910_v31 = vpack.c.bf16 %v900_v39, %v890_v38 }
 0x167   : > { %2885 = vmatpush1.bf16.msra.mxu1 %v2884_v29  ;;  %v712_v29 = vld [vmem:[%s5775_s1 + $0xea8] sm:$0xff]  ;;  %v979_v37 = vld [vmem:[%s5775_s1 + $0x1700] sm:$0xff] }
 0x168   : > { %3013 = vmatpush1.bf16.msra.mxu0 %v3012_v30  ;;  %2887 = vmatprep.subr.bf16.mxu1 %v2886_v19  ;;  %v722_v30 = vld [vmem:[%s5775_s1 + $0xef8] sm:$0xff]  ;;  %v2904_v19 = vpack.c.bf16 %v859_v17, %v849_v24  ;;  %v3048_v17 = vpack.c.bf16 %v781_v15, %v771_v13  ;;  %v811_v38 = vld [vmem:[%s5775_s1 + $0x11c0] sm:$0xff] }
 0x169   : > { %3015 = vmatprep.subr.bf16.mxu0 %v3014_v35  ;;  %v879_v35 = vld [vmem:[%s5775_s1 + $0x13e0] sm:$0xff]  ;;  %v3034_v36 = vpack.c.bf16 %v722_v30, %v712_v29  ;;  %v801_v29 = vld [vmem:[%s5775_s1 + $0x1170] sm:$0xff]  ;;  %v970_v30 = vld [vmem:[%s5775_s1 + $0x16b8] sm:$0xff] }
 0x16a   : > { %v831_v51 = vld [vmem:[%s5775_s1 + $0x1260] sm:$0xff] }
 0x16b   : > { %2889 = vmatpush1.bf16.msra.mxu1 %v2888_v40  ;;  %v732_v40 = vld [vmem:[%s5775_s1 + $0xf48] sm:$0xff]  ;;  %v1019_v1 = vld [vmem:[%s5775_s1 + $0x1840] sm:$0xff] }
 0x16c   : > { %3017 = vmatpush1.bf16.msra.mxu0 %v3016_v41  ;;  %2891 = vmatprep.subr.bf16.mxu1 %v2890_v43  ;;  %v742_v41 = vld [vmem:[%s5775_s1 + $0xf98] sm:$0xff]  ;;  %v2908_v43 = vpack.c.bf16 %v879_v35, %v869_v34  ;;  %v3052_v35 = vpack.c.bf16 %v801_v29, %v791_v47  ;;  %v851_v2 = vld [vmem:[%s5775_s1 + $0x1300] sm:$0xff]  ;;  %v901_v47 = vld [vmem:[%s5775_s1 + $0x1490] sm:$0xff] }
 0x16d   : > { %3019 = vmatprep.subr.bf16.mxu0 %v3018_v48  ;;  %v899_v48 = vld [vmem:[%s5775_s1 + $0x1480] sm:$0xff]  ;;  %v3038_v49 = vpack.c.bf16 %v742_v41, %v732_v40  ;;  %v821_v40 = vld [vmem:[%s5775_s1 + $0x1210] sm:$0xff]  ;;  %v990_v41 = vld [vmem:[%s5775_s1 + $0x1758] sm:$0xff] }
 0x16e   : > { %v1039_v15 = vld [vmem:[%s5775_s1 + $0x18e0] sm:$0xff]  ;;  %v922_v29 = vld [vmem:[%s5775_s1 + $0x1538] sm:$0xff] }
 0x16f   : > { %2893 = vmatpush1.bf16.msra.mxu1 %v2892_v54  ;;  %v752_v54 = vld [vmem:[%s5775_s1 + $0xfe8] sm:$0xff] }
 0x170   : > { %3021 = vmatpush1.bf16.msra.mxu0 %v3020_v55  ;;  %2895 = vmatprep.subr.bf16.mxu1 %v2894_v57  ;;  %v762_v55 = vld [vmem:[%s5775_s1 + $0x1038] sm:$0xff]  ;;  %v2912_v57 = vpack.c.bf16 %v899_v48, %v889_v46  ;;  %v3056_v48 = vpack.c.bf16 %v821_v40, %v811_v38  ;;  %v931_v38 = vld [vmem:[%s5775_s1 + $0x1580] sm:$0xff]  ;;  %v952_v40 = vld [vmem:[%s5775_s1 + $0x1628] sm:$0xff] }
 0x171   : > { %3023 = vmatprep.subr.bf16.mxu0 %v3022_v63  ;;  %v919_v63 = vld [vmem:[%s5775_s1 + $0x1520] sm:$0xff]  ;;  %v3042_v0 = vpack.c.bf16 %v762_v55, %v752_v54  ;;  %v841_v54 = vld [vmem:[%s5775_s1 + $0x12b0] sm:$0xff]  ;;  %v1010_v55 = vld [vmem:[%s5775_s1 + $0x17f8] sm:$0xff] }
 0x172   : > { %v2916_v8 = vpack.c.bf16 %v919_v63, %v909_v60  ;;  %v3060_v63 = vpack.c.bf16 %v841_v54, %v831_v51  ;;  %v992_v51 = vld [vmem:[%s5775_s1 + $0x1768] sm:$0xff] }
 0x173   : > { %2897 = vmatpush1.bf16.msra.mxu1 %v2896_v4  ;;  %v5506_v4 = vld [vmem:[%s3536_s23 + $0x10] sm:$0xff] }
 0x174   : > { %3025 = vmatpush1.bf16.msra.mxu0 %v3024_v5  ;;  %2899 = vmatprep.subr.bf16.mxu1 %v2898_v6  ;;  %v772_v5 = vld [vmem:[%s5775_s1 + $0x1088] sm:$0xff]  ;;  %v782_v6 = vld [vmem:[%s5775_s1 + $0x10d8] sm:$0xff] }
 0x175   : > { %3027 = vmatprep.subr.bf16.mxu0 %v3026_v10  ;;  %v929_v10 = vld [vmem:[%s5775_s1 + $0x1570] sm:$0xff]  ;;  %v3046_v14 = vpack.c.bf16 %v782_v6, %v772_v5  ;;  %v1030_v6 = vld [vmem:[%s5775_s1 + $0x1898] sm:$0xff] }
 0x176   : > { %v2920_v24 = vpack.c.bf16 %v939_v11, %v929_v10  ;;  %v861_v5 = vld [vmem:[%s5775_s1 + $0x1350] sm:$0xff] }
 0x177   : > { %2901 = vmatpush1.bf16.msra.mxu1 %v2900_v20  ;;  %v960_v20 = vld [vmem:[%s5775_s1 + $0x1668] sm:$0xff]  ;;  %v3064_v11 = vpack.c.bf16 %v861_v5, %v851_v2 }
 0x178   : > { %3029 = vmatpush1.bf16.msra.mxu0 %v3028_v22  ;;  %2903 = vmatprep.subr.bf16.mxu1 %v2902_v23  ;;  %v792_v22 = vld [vmem:[%s5775_s1 + $0x1128] sm:$0xff]  ;;  %v802_v23 = vld [vmem:[%s5775_s1 + $0x1178] sm:$0xff]  ;;  %v2922_v16 = vpack.c.bf16 %v960_v20, %v950_v18  ;;  %v871_v20 = vld [vmem:[%s5775_s1 + $0x13a0] sm:$0xff] }
 0x179   : > { %3031 = vmatprep.subr.bf16.mxu0 %v3030_v25  ;;  %v949_v25 = vld [vmem:[%s5775_s1 + $0x1610] sm:$0xff]  ;;  %v3050_v28 = vpack.c.bf16 %v802_v23, %v792_v22  ;;  %v892_v23 = vld [vmem:[%s5775_s1 + $0x1448] sm:$0xff] }
 0x17a   : > { %v2924_v34 = vpack.c.bf16 %v959_v26, %v949_v25  ;;  %v881_v22 = vld [vmem:[%s5775_s1 + $0x13f0] sm:$0xff]  ;;  %v891_v26 = vld [vmem:[%s5775_s1 + $0x1440] sm:$0xff]  ;;  %v1032_v2 = vld [vmem:[%s5775_s1 + $0x18a8] sm:$0xff] }
 0x17b   : > { %2905 = vmatpush1.bf16.msra.mxu1 %v2904_v19  ;;  %v980_v19 = vld [vmem:[%s5775_s1 + $0x1708] sm:$0xff] }
 0x17c   : > { %3033 = vmatpush1.bf16.msra.mxu0 %v3032_v53  ;;  %2907 = vmatprep.subr.bf16.mxu1 %v2906_v33  ;;  %v812_v53 = vld [vmem:[%s5775_s1 + $0x11c8] sm:$0xff]  ;;  %v822_v33 = vld [vmem:[%s5775_s1 + $0x1218] sm:$0xff]  ;;  %v2926_v27 = vpack.c.bf16 %v980_v19, %v970_v30  ;;  %v3072_v30 = vpack.c.bf16 %v901_v47, %v891_v26 }
 0x17d   : > { %3035 = vmatprep.subr.bf16.mxu0 %v3034_v36  ;;  %v969_v36 = vld [vmem:[%s5775_s1 + $0x16b0] sm:$0xff]  ;;  %v3054_v39 = vpack.c.bf16 %v822_v33, %v812_v53  ;;  %v911_v53 = vld [vmem:[%s5775_s1 + $0x14e0] sm:$0xff] }
 0x17e   : > { %v2928_v46 = vpack.c.bf16 %v979_v37, %v969_v36  ;;  %v921_v33 = vld [vmem:[%s5775_s1 + $0x1530] sm:$0xff] }
 0x17f   : > { %2909 = vmatpush1.bf16.msra.mxu1 %v2908_v43  ;;  %v1000_v43 = vld [vmem:[%s5775_s1 + $0x17a8] sm:$0xff]  ;;  %v3076_v36 = vpack.c.bf16 %v921_v33, %v911_v53 }
 0x180   : > { %3037 = vmatpush1.bf16.msra.mxu0 %v3036_v44  ;;  %2911 = vmatprep.subr.bf16.mxu1 %v2910_v31  ;;  %v832_v44 = vld [vmem:[%s5775_s1 + $0x1268] sm:$0xff]  ;;  %v842_v31 = vld [vmem:[%s5775_s1 + $0x12b8] sm:$0xff]  ;;  %v2930_v56 = vpack.c.bf16 %v1000_v43, %v990_v41  ;;  %v951_v43 = vld [vmem:[%s5775_s1 + $0x1620] sm:$0xff] }
 0x181   : > { %3039 = vmatprep.subr.bf16.mxu0 %v3038_v49  ;;  %v989_v49 = vld [vmem:[%s5775_s1 + $0x1750] sm:$0xff]  ;;  %v3058_v52 = vpack.c.bf16 %v842_v31, %v832_v44  ;;  %v972_v31 = vld [vmem:[%s5775_s1 + $0x16c8] sm:$0xff] }
 0x182   : > { %1872 = vmatmul.mubr.f32.vlgmr.msra.gmra.mrb[4].mxu1 %v5506_v4  ;;  %v2932_v60 = vpack.c.bf16 %v999_v50, %v989_v49  ;;  %v961_v44 = vld [vmem:[%s5775_s1 + $0x1670] sm:$0xff]  ;;  %v971_v49 = vld [vmem:[%s5775_s1 + $0x16c0] sm:$0xff] }
 0x183   : > { %2913 = vmatpush1.bf16.msra.mxu1 %v2912_v57  ;;  %1942 = vmatprep.mubr.f32.mxu1 %v3188_v42  ;;  %v1020_v57 = vld [vmem:[%s5775_s1 + $0x1848] sm:$0xff]  ;;  %v981_v50 = vld [vmem:[%s5775_s1 + $0x1710] sm:$0xff] }
 0x184   : > { %3041 = vmatpush1.bf16.msra.mxu0 %v3040_v58  ;;  %2915 = vmatprep.subr.bf16.mxu1 %v2914_v59  ;;  %v852_v58 = vld [vmem:[%s5775_s1 + $0x1308] sm:$0xff]  ;;  %v862_v59 = vld [vmem:[%s5775_s1 + $0x1358] sm:$0xff]  ;;  %v2934_v21 = vpack.c.bf16 %v1020_v57, %v1010_v55  ;;  %v3088_v54 = vpack.c.bf16 %v981_v50, %v971_v49  ;;  %v991_v57 = vld [vmem:[%s5775_s1 + $0x1760] sm:$0xff]  ;;  %v2196_v49 = vstv %s2296_s18 }
 0x185   : > { %3043 = vmatprep.subr.bf16.mxu0 %v3042_v0  ;;  %v1009_v0 = vld [vmem:[%s5775_s1 + $0x17f0] sm:$0xff]  ;;  %v3062_v3 = vpack.c.bf16 %v862_v59, %v852_v58  ;;  %v1012_v59 = vld [vmem:[%s5775_s1 + $0x1808] sm:$0xff] }
 0x186   : > { %v2936_v10 = vpack.c.bf16 %v1019_v1, %v1009_v0  ;;  %v1001_v58 = vld [vmem:[%s5775_s1 + $0x17b0] sm:$0xff]  ;;  %v1011_v0 = vld [vmem:[%s5775_s1 + $0x1800] sm:$0xff] }
 0x187   : > { %2917 = vmatpush1.bf16.msra.mxu1 %v2916_v8  ;;  %v1040_v8 = vld [vmem:[%s5775_s1 + $0x18e8] sm:$0xff]  ;;  %v1021_v1 = vld [vmem:[%s5775_s1 + $0x1850] sm:$0xff] }
 0x188   : > { %3045 = vmatpush1.bf16.msra.mxu0 %v3044_v32  ;;  %2919 = vmatprep.subr.bf16.mxu1 %v2918_v9  ;;  %v872_v32 = vld [vmem:[%s5775_s1 + $0x13a8] sm:$0xff]  ;;  %v882_v9 = vld [vmem:[%s5775_s1 + $0x13f8] sm:$0xff]  ;;  %v2938_v13 = vpack.c.bf16 %v1040_v8, %v1030_v6  ;;  %v3096_v5 = vpack.c.bf16 %v1021_v1, %v1011_v0  ;;  %v1031_v8 = vld [vmem:[%s5775_s1 + $0x18a0] sm:$0xff] }
 0x189   : > { %3047 = vmatprep.subr.bf16.mxu0 %v3046_v14  ;;  %v1029_v14 = vld [vmem:[%s5775_s1 + $0x1890] sm:$0xff]  ;;  %v3066_v18 = vpack.c.bf16 %v882_v9, %v872_v32 }
 0x18a   : > { %v1041_v32 = vld [vmem:[%s5775_s1 + $0x18f0] sm:$0xff] }
 0x18b   : > { %2921 = vmatpush1.bf16.msra.mxu1 %v2920_v24  ;;  %v902_v24 = vld [vmem:[%s5775_s1 + $0x1498] sm:$0xff]  ;;  %v3100_v9 = vpack.c.bf16 %v1041_v32, %v1031_v8 }
 0x18c   : > { %3049 = vmatpush1.bf16.msra.mxu0 %v3048_v17  ;;  %2923 = vmatprep.subr.bf16.mxu1 %v2922_v16  ;;  %v2940_v17 = vpack.c.bf16 %v1039_v15, %v1029_v14  ;;  %v3068_v16 = vpack.c.bf16 %v881_v22, %v871_v20  ;;  %v3070_v25 = vpack.c.bf16 %v902_v24, %v892_v23  ;;  %v2180_v22 = vstv %s2292_s15 }
 0x18d   : > { %3051 = vmatprep.subr.bf16.mxu0 %v3050_v28  ;;  %v912_v28 = vld [vmem:[%s5775_s1 + $0x14e8] sm:$0xff] }
 0x18e   : > { %v3074_v19 = vpack.c.bf16 %v922_v29, %v912_v28  ;;  %v1065_v29 = vsub.s32 4, %v5124_v45 }
 0x18f   : > { %2925 = vmatpush1.bf16.msra.mxu1 %v2924_v34  ;;  %v3159_v34 = vld [vmem:[%s3536_s23 + $0x20] sm:$0xff] }
 0x190   : > { %3053 = vmatpush1.bf16.msra.mxu0 %v3052_v35  ;;  %2927 = vmatprep.subr.bf16.mxu1 %v2926_v27  ;;  %v932_v35 = vld [vmem:[%s5775_s1 + $0x1588] sm:$0xff]  ;;  %v942_v27 = vld [vmem:[%s5775_s1 + $0x15d8] sm:$0xff] }
 0x191   : > { %3055 = vmatprep.subr.bf16.mxu0 %v3054_v39  ;;  %v3078_v37 = vpack.c.bf16 %v942_v27, %v932_v35  ;;  %v941_v39 = vld [vmem:[%s5775_s1 + $0x15d0] sm:$0xff]  ;;  %v2188_v27 = vstv %s2294_s4 }
 0x193   : > { %2929 = vmatpush1.bf16.msra.mxu1 %v2928_v46  ;;  %v982_v46 = vld [vmem:[%s5775_s1 + $0x1718] sm:$0xff] }
 0x194   : > { %3057 = vmatpush1.bf16.msra.mxu0 %v3056_v48  ;;  %2931 = vmatprep.subr.bf16.mxu1 %v2930_v56  ;;  %v3084_v48 = vpack.c.bf16 %v961_v44, %v951_v43  ;;  %v3086_v56 = vpack.c.bf16 %v982_v46, %v972_v31  ;;  %v1077_v43 = vsub.s32 7, %v5124_v45 }
 0x195   : > { %3059 = vmatprep.subr.bf16.mxu0 %v3058_v52  ;;  %v1002_v52 = vld [vmem:[%s5775_s1 + $0x17b8] sm:$0xff] }
 0x196   : > { %v3090_v55 = vpack.c.bf16 %v1002_v52, %v992_v51  ;;  %v1078_v31 = vrot.slane %v5153_v61, %v1077_v43  ;;  %v2200_v52 = vstv %s2297_s19 }
 0x197   : > { %2933 = vmatpush1.bf16.msra.mxu1 %v2932_v60  ;;  %v1022_v60 = vld [vmem:[%s5775_s1 + $0x1858] sm:$0xff] }
 0x198   : > { %3061 = vmatpush1.bf16.msra.mxu0 %v3060_v63  ;;  %2935 = vmatprep.subr.bf16.mxu1 %v2934_v21  ;;  %v3092_v63 = vpack.c.bf16 %v1001_v58, %v991_v57  ;;  %v3094_v21 = vpack.c.bf16 %v1022_v60, %v1012_v59  ;;  %v1044_v60 = vld [vmem:[%s5776_s2 + $0x8] sm:$0x3] }
 0x199   : > { %3063 = vmatprep.subr.bf16.mxu0 %v3062_v3  ;;  %v1042_v3 = vld [vmem:[%s5775_s1 + $0x18f8] sm:$0xff] }
 0x19a   : > { %v3098_v6 = vpack.c.bf16 %v1042_v3, %v1032_v2  ;;  %v2204_v2 = vstv %s2298_s24 }
 0x19b   : > { %2937 = vmatpush1.bf16.msra.mxu1 %v2936_v10  ;;  %v1057_v10 = vsub.s32 2, %v5124_v45 }
 0x19c   : > { %3065 = vmatpush1.bf16.msra.mxu0 %v3064_v11  ;;  %2939 = vmatprep.subr.bf16.mxu1 %v2938_v13  ;;  %v1061_v11 = vsub.s32 3, %v5124_v45 }
 0x19d   : > { %3067 = vmatprep.subr.bf16.mxu0 %v3066_v18  ;;  %v1058_v13 = vrot.slane %v5153_v61, %v1057_v10 }
 0x19e   : > { %v1062_v14 = vrot.slane %v5153_v61, %v1061_v11  ;;  %v2212_v11 = vstv %s2211_s26 }
 0x19f   : > { %2941 = vmatpush1.bf16.msra.mxu1 %v2940_v17  ;;  %v2184_v17 = vstv %s2293_s16 }
 0x1a0   : > { %3069 = vmatpush1.bf16.msra.mxu0 %v3068_v16 }
 0x1a1   : > { %3071 = vmatprep.subr.bf16.mxu0 %v3070_v25 }
 0x1a2   : > { %1943 = vmatmul.mubr.f32.vlgmr.msra.gmra.mrb[4].mxu1 %v3159_v34 }
 0x1a3   : > { %2085 = vmatmul.mubr.f32.vlgmr.msra.gmra.mrb[4].mxu0 %v5506_v4  ;;  %v962_v4 = vld [vmem:[%s5775_s1 + $0x1678] sm:$0xff] }
 0x1a4   : > { %3073 = vmatpush1.bf16.msra.mxu0 %v3072_v30  ;;  %2155 = vmatprep.mubr.f32.mxu0 %v3188_v42  ;;  %v3080_v42 = vpack.c.bf16 %v941_v39, %v931_v38  ;;  %v3082_v41 = vpack.c.bf16 %v962_v4, %v952_v40  ;;  %v1069_v30 = vsub.s32 5, %v5124_v45  ;;  %v2192_v38 = vstv %s2295_s17 }
 0x1a5   : > { %3075 = vmatprep.subr.bf16.mxu0 %v3074_v19  ;;  %v1066_v19 = vrot.slane %v5153_v61, %v1065_v29 }
 0x1a6   : > { %v1070_v53 = vrot.slane %v5153_v61, %v1069_v30 }
 0x1a8   : > { %3077 = vmatpush1.bf16.msra.mxu0 %v3076_v36 }
 0x1a9   : > { %3079 = vmatprep.subr.bf16.mxu0 %v3078_v37 }
 0x1ac   : > { %3081 = vmatpush1.bf16.msra.mxu0 %v3080_v42 }
 0x1ad   : > { %3083 = vmatprep.subr.bf16.mxu0 %v3082_v41  ;;  %v1073_v41 = vsub.s32 6, %v5124_v45 }
 0x1af   : > { %v1074_v44 = vrot.slane %v5153_v61, %v1073_v41  ;;  %v1082_v61 = vrot.slane %v1044_v60, %v1049_v62 }
 0x1b0   : > { %3085 = vmatpush1.bf16.msra.mxu0 %v3084_v48 }
 0x1b1   : > { %3087 = vmatprep.subr.bf16.mxu0 %v3086_v56 }
 0x1b4   : > { %3089 = vmatpush1.bf16.msra.mxu0 %v3088_v54 }
 0x1b5   : > { %3091 = vmatprep.subr.bf16.mxu0 %v3090_v55 }
 0x1b8   : > { %3093 = vmatpush1.bf16.msra.mxu0 %v3092_v63  ;;  %v1086_v63 = vrot.slane %v1044_v60, %v1053_v7 }
 0x1b9   : > { %3095 = vmatprep.subr.bf16.mxu0 %v3094_v21 }
 0x1bc   : > { %3097 = vmatpush1.bf16.msra.mxu0 %v3096_v5 }
 0x1bd   : > { %3099 = vmatprep.subr.bf16.mxu0 %v3098_v6  ;;  %v2208_v6 = vstv %s2299_s25 }
 0x1c0   : > { %3101 = vmatpush1.bf16.msra.mxu0 %v3100_v9 }
 0x1c3   : > { %2156 = vmatmul.mubr.f32.vlgmr.msra.gmra.mrb[4].mxu0 %v3159_v34 }
 0x1d5   : > { %v1518_v15 = vpop.f32.mrb[2].mxu1 }
 0x1d6   : > { %v3106_v18 = vadd.f32 %v1518_v15, %v1058_v13  ;;  %v1520_v20 = vpop.f32.mrb[3].mxu1 }
 0x1d7   : > { %v3107_v23 = vadd.f32 %v1520_v20, %v1062_v14 }
 0x1d8   : > { %v2164_v24 = vmax.f32 %v3106_v18, 0.0 }
 0x1d9   : > { %v2165_v16 = vmax.f32 %v3107_v23, 0.0 }
 0x1da   : > { %v2181_v25 = vmul.f32 %v2180_v22, %v2164_v24 }
 0x1db   : > { %v2185_v26 = vmul.f32 %v2184_v17, %v2165_v16 }
 0x1dc   : > { %v2182_v47 = vadd.f32 %v2181_v25, %v5285_v12 }
 0x1de   : > { %v2186_v28 = vadd.f32 %v2185_v26, %v2182_v47 }
 0x1f6   : > { %v1731_v33 = vpop.f32.mrb[2].mxu0 }
 0x1f7   : > { %v3108_v34 = vadd.f32 %v1731_v33, %v1066_v19  ;;  %v1733_v35 = vpop.f32.mrb[3].mxu0 }
 0x1f8   : > { %v3109_v36 = vadd.f32 %v1733_v35, %v1070_v53 }
 0x1f9   : > { %v2166_v37 = vmax.f32 %v3108_v34, 0.0 }
 0x1fa   : > { %v2167_v39 = vmax.f32 %v3109_v36, 0.0 }
 0x1fb   : > { %v2189_v12 = vmul.f32 %v2188_v27, %v2166_v37 }
 0x1fc   : > { %v2193_v40 = vmul.f32 %v2192_v38, %v2167_v39 }
 0x1fd   : > { %v2190_v4 = vadd.f32 %v2189_v12, %v2186_v28 }
 0x1ff   : > { %v2194_v42 = vadd.f32 %v2193_v40, %v2190_v4 }
 0x275   : > { %v1944_v46 = vpop.f32.mrb[4].mxu1 }
 0x276   : > { %v3110_v48 = vadd.f32 %v1944_v46, %v1074_v44  ;;  %v1946_v56 = vpop.f32.mrb[5].mxu1 }
 0x277   : > { %v3111_v50 = vadd.f32 %v1946_v56, %v1078_v31 }
 0x278   : > { %v2168_v51 = vmax.f32 %v3110_v48, 0.0 }
 0x279   : > { %v2169_v54 = vmax.f32 %v3111_v50, 0.0 }
 0x27a   : > { %v2197_v55 = vmul.f32 %v2196_v49, %v2168_v51 }
 0x27b   : > { %v2201_v57 = vmul.f32 %v2200_v52, %v2169_v54 }
 0x27c   : > { %v2198_v58 = vadd.f32 %v2197_v55, %v2194_v42 }
 0x27e   : > { %v2202_v59 = vadd.f32 %v2201_v57, %v2198_v58 }
 0x296   : > { %v2157_v21 = vpop.f32.mrb[4].mxu0 }
 0x297   : > { %v3112_v0 = vadd.f32 %v2157_v21, %v1082_v61  ;;  %v2159_v1 = vpop.f32.mrb[5].mxu0 }
 0x298   : > { %v3113_v3 = vadd.f32 %v2159_v1, %v1086_v63 }
 0x299   : > { %v2170_v5 = vmax.f32 %v3112_v0, 0.0 }
 0x29a   : > { %v2171_v8 = vmax.f32 %v3113_v3, 0.0 }
 0x29b   : > { %v2205_v32 = vmul.f32 %v2204_v2, %v2170_v5 }
 0x29c   : > { %v2209_v9 = vmul.f32 %v2208_v6, %v2171_v8 }
 0x29d   : > { %v2206_v10 = vadd.f32 %v2205_v32, %v2202_v59 }
 0x29f   : > { %v2210_v13 = vadd.f32 %v2209_v9, %v2206_v10 }
 0x2a1   : > { %v2213_v62 = vadd.f32 %v2212_v11, %v2210_v13 }
 0x2a3   : > { %v2214_v14 = vsub.f32 %v2213_v62, %v2213_v62 }
 0x2a5   : > { %v2215_v45 = vadd.f32 1.0, %v2214_v14 }
 0x2a7   : > { %2216 = vst [vmem:[%s237_s27] sm:$0xff] %v2215_v45 }
 0x2a8 PF: > { %s17_s20 = sadd.s32 1, %s3185_s20  }
 0x2a9   : > { %p14_p1 = scmp.ge.s32.totalorder %s17_s20, 5  }
 0x2ab   :  { %16 = sbr.rel (!%p14_p1) target bundleno = 3 (0x3), region = 75 }
 0x2b2   :  { %2236 = vsyncpa [#allocation4], 1 }
 0x2b3   :  { %2238 = vsyncpa [#allocation4 + $0x1], 1 }

</bundles_post_ra>
